<compile_context>
chip_gen: v7x
topology: tpu7x:2x2x1
jax: 0.10.0
libtpu: 0.0.40
codegen_flags: <defaults>
</compile_context>

<pallas_src>
from functools import partial

import jax
import jax.numpy as jnp
from jax.experimental import pallas as pl
from jax.experimental.pallas import tpu as pltpu


F_P = 128                 # padded (lane-dense) feature width used for every layer
ONES_LANE = F_P - 1       # constant-1 lane used to fold the bias into the weights


# ----------------------------- Pallas kernel -------------------------------

def _sage_layer_kernel(a_ref, hs_ref, hd_ref, inv_ref, w_ref, o_ref,
                       acc_ref, xcat_ref, *, apply_relu):
    """One SAGEConv layer, tiled: grid = (dst tiles [parallel], src tiles [arbitrary])."""
    k = pl.program_id(1)

    @pl.when(k == 0)
    def _():
        acc_ref[...] = jnp.zeros_like(acc_ref)

    # un-normalized neighbor sum: (edge-count adjacency tile) @ (src feature tile)
    acc_ref[...] += jnp.dot(a_ref[...], hs_ref[...],
                            preferred_element_type=jnp.float32)

    @pl.when(k == pl.num_programs(1) - 1)
    def _():
        # mean-normalize with per-row 1/deg (f32 VPU) and pack [agg | h_dst] into a
        # bf16 VMEM scratch so both SAGE transforms (+bias) run as ONE K=256 MXU call.
        xcat_ref[:, :F_P] = (acc_ref[...] * inv_ref[...]).astype(jnp.bfloat16)
        xcat_ref[:, F_P:] = hd_ref[...]
        out = jnp.dot(xcat_ref[...], w_ref[...],
                      preferred_element_type=jnp.float32)
        if apply_relu:
            out = jnp.maximum(out, 0.0)     # ReLU; keeps the ones lane at exactly 1.0
        o_ref[...] = out.astype(o_ref.dtype)


def _pick_tile(n_pad, max_tile):
    """Largest multiple of 128 that divides n_pad and is <= max_tile."""
    t = min(max_tile, n_pad)
    while n_pad % t:
        t -= F_P
    return t


def sage_layer(a_cnt, h, inv_deg, w_pack, *, apply_relu,
               tile_dst=128, max_tile_src=256):
    """One SAGEConv layer as a tiled pallas_call (dst 'parallel', src 'arbitrary')."""
    n_dst_pad, n_src_pad = a_cnt.shape
    tile_dst = min(tile_dst, n_dst_pad)
    tile_src = _pick_tile(n_src_pad, max_tile_src)
    grid = (n_dst_pad // tile_dst, n_src_pad // tile_src)

    # advisory cost hint for XLA's scheduler around the custom call
    flops = 2 * n_dst_pad * n_src_pad * F_P + 2 * n_dst_pad * (2 * F_P) * F_P
    bytes_accessed = (a_cnt.size * 2 + h.size * 2 * 2 + inv_deg.size * 4
                      + w_pack.size * 2 + n_dst_pad * F_P * 2)

    kernel = partial(_sage_layer_kernel, apply_relu=apply_relu)
    return pl.pallas_call(
        kernel,
        out_shape=jax.ShapeDtypeStruct((n_dst_pad, F_P), jnp.bfloat16),
        grid_spec=pltpu.PrefetchScalarGridSpec(
            num_scalar_prefetch=0,
            grid=grid,
            in_specs=[
                pl.BlockSpec((tile_dst, tile_src), lambda i, k: (i, k)),  # A tile
                pl.BlockSpec((tile_src, F_P), lambda i, k: (k, 0)),       # h, src rows
                pl.BlockSpec((tile_dst, F_P), lambda i, k: (i, 0)),       # h, dst rows (root)
                pl.BlockSpec((tile_dst, 1), lambda i, k: (i, 0)),         # 1/deg per dst row
                pl.BlockSpec((2 * F_P, F_P), lambda i, k: (0, 0)),        # [W_l ; W_r(+bias)]
            ],
            out_specs=pl.BlockSpec((tile_dst, F_P), lambda i, k: (i, 0)),
            scratch_shapes=[
                pltpu.VMEM((tile_dst, F_P), jnp.float32),        # f32 aggregation accumulator
                pltpu.VMEM((tile_dst, 2 * F_P), jnp.bfloat16),   # packed [agg | h_dst] tile
            ],
        ),
        compiler_params=pltpu.CompilerParams(
            dimension_semantics=("parallel", "arbitrary"),
            # explicit scoped-VMEM limit; tiles above were sized with v7x's 64 MiB in mind
            vmem_limit_bytes=32 * 1024 * 1024,
        ),
        cost_estimate=pl.CostEstimate(flops=flops, transcendentals=0,
                                      bytes_accessed=bytes_accessed),
    )(a_cnt, h, h, inv_deg, w_pack)


# --------------------------- host-side prep (run once) -----------------------

def _round_up(n, m):
    return ((n + m - 1) // m) * m


def prepare_adjacency(edge_index, num_src, num_dst):
    """Dense edge-count adjacency (bf16, 128-padded) + f32 1/deg column.

    Entries are small integers (exact in bf16); the mean normalisation is applied
    in-kernel so no 1/deg precision is lost to bf16.
    """
    src, dst = edge_index
    n_dst_pad, n_src_pad = _round_up(num_dst, F_P), _round_up(num_src, F_P)
    cnt = jnp.zeros((n_dst_pad, n_src_pad), jnp.float32).at[dst, src].add(1.0)
    deg = cnt.sum(axis=1, keepdims=True)
    inv_deg = jnp.where(deg > 0.0, 1.0 / jnp.maximum(deg, 1.0), 0.0)
    return cnt.astype(jnp.bfloat16), inv_deg.astype(jnp.float32)


def pack_sage_weights(w_l, w_r, b, is_last):
    """Pad W_l / W_r to 128-wide tiles, fold bias via the ones lane, stack along K."""
    f_in, f_out = w_l.shape
    assert f_in < ONES_LANE and f_out < ONES_LANE, "lane 127 is reserved for the bias"
    wl = jnp.zeros((F_P, F_P), jnp.float32).at[:f_in, :f_out].set(w_l)
    wr = jnp.zeros((F_P, F_P), jnp.float32).at[:f_in, :f_out].set(w_r)
    wr = wr.at[ONES_LANE, :f_out].set(b)            # bias (h_dst ones lane is exactly 1)
    if not is_last:
        wr = wr.at[ONES_LANE, ONES_LANE].set(1.0)   # propagate ones lane to next layer
    return jnp.concatenate([wl, wr], axis=0).astype(jnp.bfloat16)   # [2*F_P, F_P]


def prepare_features(x):
    """Zero-pad features to a 128-wide bf16 slab with the constant ones lane set."""
    n, f = x.shape
    n_pad = _round_up(n, F_P)
    xp = (jnp.zeros((n_pad, F_P), jnp.float32)
          .at[:n, :f].set(x)
          .at[:, ONES_LANE].set(1.0))
    return xp.astype(jnp.bfloat16)


# ------------------------------ forward / reference --------------------------

@jax.jit
def graphsage_forward(a_cnts, inv_degs, w_packs, x_pad):
    """'original' variant: SAGEConv stack, ReLU except after the last layer."""
    h = x_pad
    n_layers = len(a_cnts)
    for i in range(n_layers):
        h = sage_layer(a_cnts[i], h, inv_degs[i], w_packs[i],
                       apply_relu=(i != n_layers - 1))
    return h            # bf16 [n_dst_last_pad, 128]; slice to [n_seeds, out_size] outside


def graphsage_reference(edge_lists, node_counts, params, x):
    """Plain-JAX reference: f32 math on the same bf16-rounded x / weights."""
    q = lambda t: t.astype(jnp.bfloat16).astype(jnp.float32)
    h = q(x)
    n = len(params)
    for i, ((src, dst), p) in enumerate(zip(edge_lists, params)):
        num_src, num_dst = node_counts[i], node_counts[i + 1]
        cnt = jnp.zeros((num_dst, num_src), jnp.float32).at[dst, src].add(1.0)
        deg = cnt.sum(axis=1, keepdims=True)
        agg = (cnt @ h) / jnp.where(deg > 0.0, deg, 1.0)
        out = agg @ q(p["w_l"]) + h[:num_dst] @ q(p["w_r"]) + q(p["b"])
        if i != n - 1:
            out = jnp.maximum(out, 0.0)
        h = out
    return h


def init_params(key, in_size, hidden_size, out_size, n_layers):
    sizes = [in_size] + [hidden_size] * (n_layers - 1) + [out_size]
    params = []
    for i in range(n_layers):
        key, k1, k2, k3 = jax.random.split(key, 4)
        f_in, f_out = sizes[i], sizes[i + 1]
        params.append({
            "w_l": 0.1 * jax.random.normal(k1, (f_in, f_out), jnp.float32),
            "w_r": 0.1 * jax.random.normal(k2, (f_in, f_out), jnp.float32),
            "b": 0.1 * jax.random.normal(k3, (f_out,), jnp.float32),
        })
    return params


# -------------------------------- main ---------------------------------------

if __name__ == "__main__":
    key = jax.random.PRNGKey(0)

    in_size, hidden_size, out_size, n_layers = 16, 32, 8, 2
    # layer-wise sampled subgraph sizes: src nodes of layer i == dst of layer i-1
    node_counts = [400, 200, 100]   # [n_src_layer0, n_dst0 (=n_src1), n_seeds]
    fanout = 4

    key, kx = jax.random.split(key)
    x = jax.random.normal(kx, (node_counts[0], in_size), jnp.float32)

    # deterministic synthetic sampled subgraphs (edge_index per layer)
    edge_lists = []
    for i in range(n_layers):
        num_src, num_dst = node_counts[i], node_counts[i + 1]
        key, ke = jax.random.split(key)
        dst = jnp.repeat(jnp.arange(num_dst, dtype=jnp.int32), fanout)
        src = jax.random.randint(ke, (num_dst * fanout,), 0, num_src, dtype=jnp.int32)
        edge_lists.append((src, dst))

    params = init_params(key, in_size, hidden_size, out_size, n_layers)

    # one-time host-side prep, hoisted out of the forward path
    a_cnts, inv_degs = [], []
    for i in range(n_layers):
        a, inv = prepare_adjacency(edge_lists[i], node_counts[i], node_counts[i + 1])
        a_cnts.append(a)
        inv_degs.append(inv)
    w_packs = [pack_sage_weights(p["w_l"], p["w_r"], p["b"], i == n_layers - 1)
               for i, p in enumerate(params)]
    x_pad = prepare_features(x)

    out_pad = graphsage_forward(a_cnts, inv_degs, w_packs, x_pad)
    out_pad = jax.block_until_ready(out_pad)
    out = out_pad[:node_counts[-1], :out_size].astype(jnp.float32)

    ref = graphsage_reference(edge_lists, node_counts, params, x)

    assert out.shape == (node_counts[-1], out_size), out.shape
    assert bool(jnp.all(jnp.isfinite(out)))
    max_err = float(jnp.max(jnp.abs(out - ref)))
    assert jnp.allclose(out, ref, atol=3e-2, rtol=3e-2), max_err
    print("KERNEL_OK")
</pallas_src>

<mosaic_0001>
module attributes {stable_mosaic.version = 11 : i64} {
  func.func @_sage_layer_kernel(%arg0: i32, %arg1: i32, %arg2: memref<128x256xbf16, #tpu.memory_space<vmem>>, %arg3: memref<256x128xbf16, #tpu.memory_space<vmem>>, %arg4: memref<128x128xbf16, #tpu.memory_space<vmem>>, %arg5: memref<128x1xf32, #tpu.memory_space<vmem>>, %arg6: memref<256x128xbf16, #tpu.memory_space<vmem>>, %arg7: memref<128x128xbf16, #tpu.memory_space<vmem>>, %arg8: memref<128x128xf32, #tpu.memory_space<vmem>>, %arg9: memref<128x256xbf16, #tpu.memory_space<vmem>>) attributes {dimension_semantics = [#tpu.dimension_semantics<parallel>, #tpu.dimension_semantics<arbitrary>], iteration_bounds = array<i64: 2, 2>, scalar_prefetch = 0 : i64, scratch_operands = 2 : i64, tpu.core_type = #tpu.core_type<tc>, window_params = [{transform_indices = @transform_0, window_bounds = array<i64: 128, 256>}, {transform_indices = @transform_1, window_bounds = array<i64: 256, 128>}, {transform_indices = @transform_2, window_bounds = array<i64: 128, 128>}, {transform_indices = @transform_3, window_bounds = array<i64: 128, 1>}, {pipeline_mode = #tpu.pipeline_mode<synchronous>, transform_indices = @transform_4, window_bounds = array<i64: 256, 128>}, {transform_indices = @transform_5, window_bounds = array<i64: 128, 128>}]} {
    %c0_i32 = arith.constant 0 : i32
    %0 = arith.cmpi eq, %arg1, %c0_i32 : i32
    %1 = arith.extui %0 : i1 to i32
    %c0_i32_0 = arith.constant 0 : i32
    %2 = arith.cmpi ne, %1, %c0_i32_0 : i32
    scf.if %2 {
      %cst_9 = arith.constant 0.000000e+00 : f32
      %12 = vector.broadcast %cst_9 : f32 to vector<128x128xf32>
      %c0_10 = arith.constant 0 : index
      %c0_11 = arith.constant 0 : index
      %13 = vector.load %arg8[%c0_10, %c0_11] : memref<128x128xf32, #tpu.memory_space<vmem>>, vector<128x128xf32>
      tpu.vector_store %arg8[%c0_10, %c0_11], %12 {strides = array<i32>} : memref<128x128xf32, #tpu.memory_space<vmem>>, vector<128x128xf32>,
    } else {
    }
    %c0 = arith.constant 0 : index
    %c0_1 = arith.constant 0 : index
    %3 = vector.load %arg8[%c0, %c0_1] : memref<128x128xf32, #tpu.memory_space<vmem>>, vector<128x128xf32>
    %c0_2 = arith.constant 0 : index
    %c0_3 = arith.constant 0 : index
    %4 = vector.load %arg2[%c0_2, %c0_3] : memref<128x256xbf16, #tpu.memory_space<vmem>>, vector<128x256xbf16>
    %c0_4 = arith.constant 0 : index
    %c0_5 = arith.constant 0 : index
    %5 = vector.load %arg3[%c0_4, %c0_5] : memref<256x128xbf16, #tpu.memory_space<vmem>>, vector<256x128xbf16>
    %cst = arith.constant dense<0.000000e+00> : vector<128x128xf32>
    %6 = tpu.matmul %4, %5, %cst {dimension_numbers = #tpu.dot_dimension_numbers<[1], [0], [0], [1], [0, 0, 1, 1], [], []>} : vector<128x256xbf16>, vector<256x128xbf16>, vector<128x128xf32> -> vector<128x128xf32>
    %7 = arith.addf %3, %6 : vector<128x128xf32>
    %c0_6 = arith.constant 0 : index
    %c0_7 = arith.constant 0 : index
    %8 = vector.load %arg8[%c0_6, %c0_7] : memref<128x128xf32, #tpu.memory_space<vmem>>, vector<128x128xf32>
    tpu.vector_store %arg8[%c0_6, %c0_7], %7 {strides = array<i32>} : memref<128x128xf32, #tpu.memory_space<vmem>>, vector<128x128xf32>,
    %c1_i32 = arith.constant 1 : i32
    %9 = arith.cmpi eq, %arg1, %c1_i32 : i32
    %10 = arith.extui %9 : i1 to i32
    %c0_i32_8 = arith.constant 0 : i32
    %11 = arith.cmpi ne, %10, %c0_i32_8 : i32
    scf.if %11 {
      %c0_9 = arith.constant 0 : index
      %c0_10 = arith.constant 0 : index
      %12 = vector.load %arg8[%c0_9, %c0_10] : memref<128x128xf32, #tpu.memory_space<vmem>>, vector<128x128xf32>
      %c0_11 = arith.constant 0 : index
      %c0_12 = arith.constant 0 : index
      %13 = vector.load %arg5[%c0_11, %c0_12] : memref<128x1xf32, #tpu.memory_space<vmem>>, vector<128x1xf32>
      %14 = vector.broadcast %13 : vector<128x1xf32> to vector<128x128xf32>
      %15 = arith.mulf %12, %14 : vector<128x128xf32>
      %16 = arith.truncf %15 : vector<128x128xf32> to vector<128x128xbf16>
      %c0_13 = arith.constant 0 : index
      %c0_14 = arith.constant 0 : index
      %17 = vector.load %arg9[%c0_13, %c0_14] : memref<128x256xbf16, #tpu.memory_space<vmem>>, vector<128x128xbf16>
      tpu.vector_store %arg9[%c0_13, %c0_14], %16 {strides = array<i32>} : memref<128x256xbf16, #tpu.memory_space<vmem>>, vector<128x128xbf16>,
      %c0_15 = arith.constant 0 : index
      %c0_16 = arith.constant 0 : index
      %18 = vector.load %arg4[%c0_15, %c0_16] : memref<128x128xbf16, #tpu.memory_space<vmem>>, vector<128x128xbf16>
      %c0_17 = arith.constant 0 : index
      %c128 = arith.constant 128 : index
      %19 = vector.load %arg9[%c0_17, %c128] : memref<128x256xbf16, #tpu.memory_space<vmem>>, vector<128x128xbf16>
      tpu.vector_store %arg9[%c0_17, %c128], %18 {strides = array<i32>} : memref<128x256xbf16, #tpu.memory_space<vmem>>, vector<128x128xbf16>,
      %c0_18 = arith.constant 0 : index
      %c0_19 = arith.constant 0 : index
      %20 = vector.load %arg9[%c0_18, %c0_19] : memref<128x256xbf16, #tpu.memory_space<vmem>>, vector<128x256xbf16>
      %c0_20 = arith.constant 0 : index
      %c0_21 = arith.constant 0 : index
      %21 = vector.load %arg6[%c0_20, %c0_21] : memref<256x128xbf16, #tpu.memory_space<vmem>>, vector<256x128xbf16>
      %cst_22 = arith.constant dense<0.000000e+00> : vector<128x128xf32>
      %22 = tpu.matmul %20, %21, %cst_22 {dimension_numbers = #tpu.dot_dimension_numbers<[1], [0], [0], [1], [0, 0, 1, 1], [], []>} : vector<128x256xbf16>, vector<256x128xbf16>, vector<128x128xf32> -> vector<128x128xf32>
      %cst_23 = arith.constant 0.000000e+00 : f32
      %23 = vector.broadcast %cst_23 : f32 to vector<128x128xf32>
      %24 = arith.maximumf %22, %23 : vector<128x128xf32>
      %25 = arith.truncf %24 : vector<128x128xf32> to vector<128x128xbf16>
      %c0_24 = arith.constant 0 : index
      %c0_25 = arith.constant 0 : index
      %26 = vector.load %arg7[%c0_24, %c0_25] : memref<128x128xbf16, #tpu.memory_space<vmem>>, vector<128x128xbf16>
      tpu.vector_store %arg7[%c0_24, %c0_25], %25 {strides = array<i32>} : memref<128x128xbf16, #tpu.memory_space<vmem>>, vector<128x128xbf16>,
    } else {
    }
    return
  }
  func.func @transform_0(%arg0: i32, %arg1: i32) -> (i32, i32) {
    %c0_i32 = arith.constant 0 : i32
    return %arg0, %arg1 : i32, i32
  }
  func.func @transform_1(%arg0: i32, %arg1: i32) -> (i32, i32) {
    %c0_i32 = arith.constant 0 : i32
    %c0_i32_0 = arith.constant 0 : i32
    return %arg1, %c0_i32 : i32, i32
  }
  func.func @transform_2(%arg0: i32, %arg1: i32) -> (i32, i32) {
    %c0_i32 = arith.constant 0 : i32
    %c0_i32_0 = arith.constant 0 : i32
    return %arg0, %c0_i32 : i32, i32
  }
  func.func @transform_3(%arg0: i32, %arg1: i32) -> (i32, i32) {
    %c0_i32 = arith.constant 0 : i32
    %c0_i32_0 = arith.constant 0 : i32
    return %arg0, %c0_i32 : i32, i32
  }
  func.func @transform_4(%arg0: i32, %arg1: i32) -> (i32, i32) {
    %c0_i32 = arith.constant 0 : i32
    %c0_i32_0 = arith.constant 0 : i32
    %c0_i32_1 = arith.constant 0 : i32
    return %c0_i32, %c0_i32_0 : i32, i32
  }
  func.func @transform_5(%arg0: i32, %arg1: i32) -> (i32, i32) {
    %c0_i32 = arith.constant 0 : i32
    %c0_i32_0 = arith.constant 0 : i32
    return %arg0, %c0_i32 : i32, i32
  }
}

module attributes {stable_mosaic.version = 11 : i64} {
  func.func @_sage_layer_kernel(%arg0: i32, %arg1: i32, %arg2: memref<128x256xbf16, #tpu.memory_space<vmem>>, %arg3: memref<256x128xbf16, #tpu.memory_space<vmem>>, %arg4: memref<128x128xbf16, #tpu.memory_space<vmem>>, %arg5: memref<128x1xf32, #tpu.memory_space<vmem>>, %arg6: memref<256x128xbf16, #tpu.memory_space<vmem>>, %arg7: memref<128x128xbf16, #tpu.memory_space<vmem>>, %arg8: memref<128x128xf32, #tpu.memory_space<vmem>>, %arg9: memref<128x256xbf16, #tpu.memory_space<vmem>>) attributes {dimension_semantics = [#tpu.dimension_semantics<parallel>, #tpu.dimension_semantics<arbitrary>], iteration_bounds = array<i64: 1, 1>, scalar_prefetch = 0 : i64, scratch_operands = 2 : i64, tpu.core_type = #tpu.core_type<tc>, window_params = [{transform_indices = @transform_0, window_bounds = array<i64: 128, 256>}, {transform_indices = @transform_1, window_bounds = array<i64: 256, 128>}, {transform_indices = @transform_2, window_bounds = array<i64: 128, 128>}, {transform_indices = @transform_3, window_bounds = array<i64: 128, 1>}, {pipeline_mode = #tpu.pipeline_mode<synchronous>, transform_indices = @transform_4, window_bounds = array<i64: 256, 128>}, {transform_indices = @transform_5, window_bounds = array<i64: 128, 128>}]} {
    %c0_i32 = arith.constant 0 : i32
    %0 = arith.cmpi eq, %arg1, %c0_i32 : i32
    %1 = arith.extui %0 : i1 to i32
    %c0_i32_0 = arith.constant 0 : i32
    %2 = arith.cmpi ne, %1, %c0_i32_0 : i32
    scf.if %2 {
      %cst_10 = arith.constant 0.000000e+00 : f32
      %12 = vector.broadcast %cst_10 : f32 to vector<128x128xf32>
      %c0_11 = arith.constant 0 : index
      %c0_12 = arith.constant 0 : index
      %13 = vector.load %arg8[%c0_11, %c0_12] : memref<128x128xf32, #tpu.memory_space<vmem>>, vector<128x128xf32>
      tpu.vector_store %arg8[%c0_11, %c0_12], %12 {strides = array<i32>} : memref<128x128xf32, #tpu.memory_space<vmem>>, vector<128x128xf32>,
    } else {
    }
    %c0 = arith.constant 0 : index
    %c0_1 = arith.constant 0 : index
    %3 = vector.load %arg8[%c0, %c0_1] : memref<128x128xf32, #tpu.memory_space<vmem>>, vector<128x128xf32>
    %c0_2 = arith.constant 0 : index
    %c0_3 = arith.constant 0 : index
    %4 = vector.load %arg2[%c0_2, %c0_3] : memref<128x256xbf16, #tpu.memory_space<vmem>>, vector<128x256xbf16>
    %c0_4 = arith.constant 0 : index
    %c0_5 = arith.constant 0 : index
    %5 = vector.load %arg3[%c0_4, %c0_5] : memref<256x128xbf16, #tpu.memory_space<vmem>>, vector<256x128xbf16>
    %cst = arith.constant dense<0.000000e+00> : vector<128x128xf32>
    %6 = tpu.matmul %4, %5, %cst {dimension_numbers = #tpu.dot_dimension_numbers<[1], [0], [0], [1], [0, 0, 1, 1], [], []>} : vector<128x256xbf16>, vector<256x128xbf16>, vector<128x128xf32> -> vector<128x128xf32>
    %7 = arith.addf %3, %6 : vector<128x128xf32>
    %c0_6 = arith.constant 0 : index
    %c0_7 = arith.constant 0 : index
    %8 = vector.load %arg8[%c0_6, %c0_7] : memref<128x128xf32, #tpu.memory_space<vmem>>, vector<128x128xf32>
    tpu.vector_store %arg8[%c0_6, %c0_7], %7 {strides = array<i32>} : memref<128x128xf32, #tpu.memory_space<vmem>>, vector<128x128xf32>,
    %c0_i32_8 = arith.constant 0 : i32
    %9 = arith.cmpi eq, %arg1, %c0_i32_8 : i32
    %10 = arith.extui %9 : i1 to i32
    %c0_i32_9 = arith.constant 0 : i32
    %11 = arith.cmpi ne, %10, %c0_i32_9 : i32
    scf.if %11 {
      %c0_10 = arith.constant 0 : index
      %c0_11 = arith.constant 0 : index
      %12 = vector.load %arg8[%c0_10, %c0_11] : memref<128x128xf32, #tpu.memory_space<vmem>>, vector<128x128xf32>
      %c0_12 = arith.constant 0 : index
      %c0_13 = arith.constant 0 : index
      %13 = vector.load %arg5[%c0_12, %c0_13] : memref<128x1xf32, #tpu.memory_space<vmem>>, vector<128x1xf32>
      %14 = vector.broadcast %13 : vector<128x1xf32> to vector<128x128xf32>
      %15 = arith.mulf %12, %14 : vector<128x128xf32>
      %16 = arith.truncf %15 : vector<128x128xf32> to vector<128x128xbf16>
      %c0_14 = arith.constant 0 : index
      %c0_15 = arith.constant 0 : index
      %17 = vector.load %arg9[%c0_14, %c0_15] : memref<128x256xbf16, #tpu.memory_space<vmem>>, vector<128x128xbf16>
      tpu.vector_store %arg9[%c0_14, %c0_15], %16 {strides = array<i32>} : memref<128x256xbf16, #tpu.memory_space<vmem>>, vector<128x128xbf16>,
      %c0_16 = arith.constant 0 : index
      %c0_17 = arith.constant 0 : index
      %18 = vector.load %arg4[%c0_16, %c0_17] : memref<128x128xbf16, #tpu.memory_space<vmem>>, vector<128x128xbf16>
      %c0_18 = arith.constant 0 : index
      %c128 = arith.constant 128 : index
      %19 = vector.load %arg9[%c0_18, %c128] : memref<128x256xbf16, #tpu.memory_space<vmem>>, vector<128x128xbf16>
      tpu.vector_store %arg9[%c0_18, %c128], %18 {strides = array<i32>} : memref<128x256xbf16, #tpu.memory_space<vmem>>, vector<128x128xbf16>,
      %c0_19 = arith.constant 0 : index
      %c0_20 = arith.constant 0 : index
      %20 = vector.load %arg9[%c0_19, %c0_20] : memref<128x256xbf16, #tpu.memory_space<vmem>>, vector<128x256xbf16>
      %c0_21 = arith.constant 0 : index
      %c0_22 = arith.constant 0 : index
      %21 = vector.load %arg6[%c0_21, %c0_22] : memref<256x128xbf16, #tpu.memory_space<vmem>>, vector<256x128xbf16>
      %cst_23 = arith.constant dense<0.000000e+00> : vector<128x128xf32>
      %22 = tpu.matmul %20, %21, %cst_23 {dimension_numbers = #tpu.dot_dimension_numbers<[1], [0], [0], [1], [0, 0, 1, 1], [], []>} : vector<128x256xbf16>, vector<256x128xbf16>, vector<128x128xf32> -> vector<128x128xf32>
      %23 = arith.truncf %22 : vector<128x128xf32> to vector<128x128xbf16>
      %c0_24 = arith.constant 0 : index
      %c0_25 = arith.constant 0 : index
      %24 = vector.load %arg7[%c0_24, %c0_25] : memref<128x128xbf16, #tpu.memory_space<vmem>>, vector<128x128xbf16>
      tpu.vector_store %arg7[%c0_24, %c0_25], %23 {strides = array<i32>} : memref<128x128xbf16, #tpu.memory_space<vmem>>, vector<128x128xbf16>,
    } else {
    }
    return
  }
  func.func @transform_0(%arg0: i32, %arg1: i32) -> (i32, i32) {
    %c0_i32 = arith.constant 0 : i32
    return %arg0, %arg1 : i32, i32
  }
  func.func @transform_1(%arg0: i32, %arg1: i32) -> (i32, i32) {
    %c0_i32 = arith.constant 0 : i32
    %c0_i32_0 = arith.constant 0 : i32
    return %arg1, %c0_i32 : i32, i32
  }
  func.func @transform_2(%arg0: i32, %arg1: i32) -> (i32, i32) {
    %c0_i32 = arith.constant 0 : i32
    %c0_i32_0 = arith.constant 0 : i32
    return %arg0, %c0_i32 : i32, i32
  }
  func.func @transform_3(%arg0: i32, %arg1: i32) -> (i32, i32) {
    %c0_i32 = arith.constant 0 : i32
    %c0_i32_0 = arith.constant 0 : i32
    return %arg0, %c0_i32 : i32, i32
  }
  func.func @transform_4(%arg0: i32, %arg1: i32) -> (i32, i32) {
    %c0_i32 = arith.constant 0 : i32
    %c0_i32_0 = arith.constant 0 : i32
    %c0_i32_1 = arith.constant 0 : i32
    return %c0_i32, %c0_i32_0 : i32, i32
  }
  func.func @transform_5(%arg0: i32, %arg1: i32) -> (i32, i32) {
    %c0_i32 = arith.constant 0 : i32
    %c0_i32_0 = arith.constant 0 : i32
    return %arg0, %c0_i32 : i32, i32
  }
}

</mosaic_0001>

<bundles_post_ra>
// kernel: graphsage_forward.2
= control target key start
LH: loop header
LB: loop body
LE: loop exit
PB: predicated region body
PF: predicated region fallthrough
CT: control target
= control target key end

     0   :  { %s2334_s0 = inlined_call_operand.hbm [shape: bf16[256,512], index: 0, kind: input, shape index: {}]   ;;  %s2335_s1 = inlined_call_operand.vmem [shape: bf16[512,128], index: 1, kind: input, shape index: {}, may-alias: {1,2}]   ;;  %s2336_s2 = inlined_call_operand.vmem [shape: bf16[512,128], index: 2, kind: input, shape index: {}, may-alias: {1,2}]   ;;  %s2337_s3 = inlined_call_operand.vmem [shape: f32[256,1], index: 3, kind: input, shape index: {}]   ;;  %s2338_s4 = inlined_call_operand.hbm [shape: bf16[256,128], index: 4, kind: input, shape index: {}]   ;;  %s2339_s5 = inlined_call_operand.vmem [shape: bf16[256,128], index: 5, kind: output, shape index: {}]  }
   0x1   :  { %2347 = sst [smem:[#allocation12_spill]] %s2338_s4 }
   0x2   :  { %10 = vsyncpa [#allocation5], 0 }
   0x3   :  { %12 = vsyncpa [#allocation5 + $0x1], 0 }
   0x4   :  { %13 = vsyncpa [#allocation7], 0  ;;  %s2066_s18 = smov 0   ;;  %s2068_s19 = smov 0  }
   0x5   :  { %s2070_s20 = smov 0   ;;  %s2072_s21 = smov 0  }
   0x6   :  { %s2074_s22 = smov 0   ;;  %s2076_s23 = smov 0  }
   0x7   :  { %s2078_s24 = smov 0   ;;  %s2080_s25 = smov 0  }
   0x8 LB: > { %2348 = sst [smem:[#allocation10_spill]] %s2017_s23  ;;  %s1421_s26 = sadd.s32 4294967295, %s2025_s25   ;;  %s2025_s25 = sphi %s2080_s25, %s19_s25   ;;  %s2021_s24 = sphi %s2078_s24, %s2367_s24   ;;  %s2017_s23 = sphi %s2076_s23, %s2362_s23   ;;  %s2013_s22 = sphi %s2074_s22, %s2366_s22   ;;  %s2009_s21 = sphi %s2072_s21, %s2361_s21   ;;  %s2005_s20 = sphi %s2070_s20, %s2365_s20   ;;  %s2001_s19 = sphi %s2068_s19, %s2364_s19   ;;  %s1997_s18 = sphi %s2066_s18, %s2363_s18  }
   0x9   : > { %p47_p0 = scmp.ne.s32.totalorder %s2005_s20, %s2001_s19  ;;  %p48_p1 = scmp.eq.s32.totalorder %s2025_s25, 0 }
   0xa   : > { %p53_p2 = scmp.ne.s32.totalorder %s2001_s19, %s1997_s18  ;;  %p2110_p3 = scmp.eq.s32.totalorder %s1421_s26, 0 }
   0xb   : > { %p49_p4 = por %p48_p1, %p47_p0  ;;  %p1423_p5 = scmp.ge.s32.totalorder %s2025_s25, 1 }
   0xc   : > { %s2349_s28 = scalar_select %p2110_p3, 1, 0 }
   0xd   : > { %p2117_p6 = por %p2110_p3, %p53_p2  ;;  %p189_p7 = scmp.lt.s32.totalorder %s2025_s25, 5 }
   0xe   : > { %s2027_s6 = smov [#allocation6]   ;;  %p1757_p10 = scmp.lt.s32.totalorder %s2025_s25, 4 }
   0xf   : > { %s2350_s29 = scalar_select %p2117_p6, 1, 0 }
  0x10   : > { %p2122_p8 = pnand %p1423_p5, %p189_p7  ;;  %s201_s7 = sshll.u32 %s2027_s6, 4  ;;  %s202_s7 = int_to_ptr.vmem [resolvable:$true] %s201_s7 }
  0x11   : > { %p2135_p12 = pnand %p1757_p10, %p49_p4  ;;  %s2354_s4 = sld [smem:[#allocation12_spill]] }
  0x12   : > { %s2351_s30 = scalar_select %p2122_p8, 1, 0 }
  0x13   : > { %p1748_p9 = pneg %p2122_p8 }
  0x14   : > { %s2353_s9 = scalar_select %p2135_p12, 1, 0 }
  0x15   : > { %p2131_p11 = pnand %p1748_p9, %p2110_p3 }
  0x17   : > { %s1897_s12 = scalar_lea.hbm %s2354_s4, 2048  ;;  %p1899_p0 = pneg %p2131_p11 }
  0x18   : > { %p1898_p13 = scmp.ne.s32.totalorder %s2354_s4, %s1897_s12  ;;  %p1904_p5 = scmp.lt.u32.totalorder %s1897_s12, %s2354_s4 }
  0x1a   : > { %p1900_p1 = pnand %p1899_p0, %p1898_p13 }
  0x1c   : > { %p1901_p2 = pneg %p1900_p1 }
  0x1e   : > { %p1906_p4 = pnand %p1904_p5, %p1901_p2 }
  0x20   : > { %1909 = shalt.err (!%p1906_p4)
}
  0x21   : > { %s1910_s17 = scalar_lea.vmem %s202_s7, 2048  ;;  %p1918_p3 = scmp.lt.s32.totalorder %s202_s7, %s202_s7 }
  0x22   : > { %p1911_p7 = scmp.ne.s32.totalorder %s202_s7, %s1910_s17  ;;  %p1919_p6 = scmp.lt.s32.totalorder %s1910_s17, %s1910_s17 }
  0x24   : > { %p1913_p9 = pnand %p1911_p7, %p1899_p0  ;;  %p1920_p8 = por %p1919_p6, %p1918_p3 }
  0x26   : > { %p1914_p10 = pneg %p1913_p9 }
  0x28   : > { %p1921_p12 = pnand %p1920_p8, %p1914_p10 }
  0x2a   : > { %1924 = shalt.err (!%p1921_p12)
}
  0x2b   : > { %s2028_s18 = smov 64   ;;  %s2029_s26 = smov 4  }
  0x2c   : > { %1751 = dma.hbm_to_vmem [thread:$0]  (!%p2131_p11), %s2354_s4, 2048, %s202_s7, [#allocation7], %s2028_s18, %s2028_s18, %s2029_s26  }
  0x2d   : > { %s28_s11 = sadd.s32 1, %s2017_s23  ;;  %s31_s12 = sadd.s32 1, %s2021_s24 }
  0x2e   : > { %p29_p3 = scmp.ge.s32.totalorder %s28_s11, 2  ;;  %s215_s13 = sand.u32 1, %s2005_s20  }
  0x2f   : > { %s1426_s14 = sshll.u32 %s215_s13, 7  ;;  %s1428_s16 = sshll.u32 %s2017_s23, 1 }
  0x30   : > { %s2369_s11 = smov (%p29_p3, %s28_s11), 0  ;;  %s2371_s12 = smov (!%p29_p3, %s31_s12), %s2021_s24 }
  0x31   : > { %2355 = sst [smem:[#allocation11_spill]] %s2369_s11  ;;  %s36_s15 = ssub.s32 %s2017_s23, %s2369_s11 }
  0x32   : > { %p33_p6 = scmp.ge.s32.totalorder %s2371_s12, 2  ;;  %s1518_s8 = sshll.u32 %s2021_s24, 6 }
  0x33   : > { %s219_s17 = scalar_lea.vmem [#allocation4], %s1426_s14  ;;  %s226_s18 = sadd.s32 %s1518_s8, %s1428_s16 }
  0x34   : > { %s229_s7 = sshll.u32 %s219_s17, 4  ;;  %s2373_s12 = smov (%p33_p6, %s2371_s12), 0  ;;  %s2167_s7 = int_to_ptr.vmem [resolvable:$true] %s229_s7 }
  0x35   : > { %s35_s26 = ssub.s32 %s2021_s24, %s2373_s12  ;;  %s1430_s6 = sshll.u32 %s226_s18, 6 }
  0x36   : > { %s37_s10 = sor.u32 %s36_s15, %s35_s26  ;;  %s2174_s11 = scalar_lea.hbm %s2334_s0, %s1430_s6 }
  0x37   : > { %p38_p8 = scmp.eq.s32.totalorder %s37_s10, 0  ;;  %s2356_s14 = sadd.s32 1, %s2005_s20 }
  0x38   : > { %s2181_s23 = scalar_lea.sflag [#allocation5], %s215_s13  ;;  %s1925_s16 = scalar_lea.hbm %s2174_s11, 2048 }
  0x39   : > { %s2179_s17 = scalar_select %p38_p8, %s2005_s20, %s2356_s14  }
  0x3a   : > { %p1926_p11 = scmp.ne.s32.totalorder %s2174_s11, %s1925_s16  ;;  %p2357_p12 = scmp.ne.s32.totalorder %s2353_s9, 0 }
  0x3b   : > { %s1930_s15 = scalar_lea.hbm %s2334_s0, 8192  ;;  %p1931_p2 = scmp.lt.u32.totalorder %s2174_s11, %s2334_s0 }
  0x3c   : > { %p1927_p13 = pneg %p2357_p12  ;;  %p1932_p5 = scmp.lt.u32.totalorder %s1930_s15, %s1925_s16 }
  0x3d   : > { %p1934_p7 = scmp.lt.u32.totalorder %s1925_s16, %s2174_s11 }
  0x3e   : > { %p1928_p0 = pnand %p1927_p13, %p1926_p11  ;;  %p1933_p4 = por %p1932_p5, %p1931_p2 }
  0x40   : > { %p1929_p1 = pneg %p1928_p0  ;;  %p1935_p9 = por %p1934_p7, %p1933_p4 }
  0x42   : > { %p1936_p10 = pnand %p1935_p9, %p1929_p1 }
  0x44   : > { %1939 = shalt.err (!%p1936_p10)
}
  0x45   : > { %s1940_s13 = scalar_lea.vmem %s2167_s7, 2048  ;;  %s2030_s26 = smov [#allocation4]  }
  0x46   : > { %p1941_p3 = scmp.ne.s32.totalorder %s2167_s7, %s1940_s13  ;;  %s1945_s6 = sshll.u32 %s2030_s26, 4  ;;  %s1946_s6 = int_to_ptr.vmem [resolvable:$false] %s1945_s6 }
  0x47   : > { %s1947_s10 = scalar_lea.vmem %s1946_s6, 4096  ;;  %p1948_p11 = scmp.lt.s32.totalorder %s2167_s7, %s1946_s6 }
  0x48   : > { %p1943_p6 = pnand %p1941_p3, %p1927_p13  ;;  %p1949_p0 = scmp.lt.s32.totalorder %s1947_s10, %s1940_s13 }
  0x4a   : > { %p1944_p8 = pneg %p1943_p6  ;;  %p1950_p2 = por %p1949_p0, %p1948_p11 }
  0x4c   : > { %p1951_p5 = pnand %p1950_p2, %p1944_p8 }
  0x4e   : > { %1954 = shalt.err (!%p1951_p5)
}
  0x4f   : > { %s2031_s14 = smov 256   ;;  %s2032_s16 = smov 128  }
  0x50   : > { %s2033_s4 = smov 8   ;;  %p2358_p13 = scmp.ne.s32.totalorder %s2351_s30, 0 }
  0x51   : > { %1755 = dma.hbm_to_vmem [thread:$0]  (!%p2357_p12), %s2174_s11, 2048, %s2167_s7, %s2181_s23, %s2031_s14, %s2032_s16, %s2033_s4  }
  0x52   : > { %268 = sbr.rel (%p2358_p13) target bundleno = 745 (0x2e9), region = 40  ;;  %s270_s27 = sand.u32 (!%p2358_p13), 1, %s2001_s19  }
  0x53   : > { %s1432_s15 = sshll.u32 (!%p2358_p13), %s270_s27, 7  ;;  %s271_s8 = scalar_lea.sflag (!%p2358_p13), [#allocation5], %s270_s27 }
  0x54   : > { %s2212_s18 = scalar_lea.vmem (!%p2358_p13), [#allocation4], %s1432_s15  ;;  %p2359_p1 = scmp.ne.s32.totalorder (!%p2358_p13), %s2350_s29, 0 }
  0x59   : > { %1988 = dma.done.wait (%p2359_p1), %s271_s8, 2048  }
  0x5a   : > { %1990 = vsyncadd (%p2359_p1), %s271_s8, 4294965248  ;;  %p2360_p4 = scmp.ne.s32.totalorder %s2349_s28, 0 }
  0x5c   : > { %1992 = dma.done.wait (%p2360_p4), [#allocation7], 2048  }
  0x5d   : > { %1994 = vsyncadd (%p2360_p4), [#allocation7], 4294965248  ;;  %s1434_s23 = sshll.u32 %s2009_s21, 5  ;;  %s1436_s30 = sshll.u32 %s2013_s22, 4 }
  0x5e   : > { %p323_p12 = scmp.lt.s32.totalorder %s1434_s23, 63  ;;  %p329_p7 = scmp.lt.s32.totalorder %s1436_s30, 63 }
  0x5f   : > { %p335_p9 = scmp.lt.s32.totalorder %s1436_s30, 31  ;;  %p1442_p10 = scmp.ne.s32.totalorder %s2009_s21, 0 }
  0x60   : > { %s2375_s23 = smov (!%p323_p12, %s1434_s23), 63  ;;  %v2034_v0 = vmov (!%p1442_p10), 0.0  }
  0x61   : > { %s330_s9 = scalar_select %p329_p7, %s1436_s30, 63 }
  0x62   : > { %s1435_s11 = sshll.u32 %s2375_s23, 2  ;;  %s2377_s30 = smov (!%p335_p9, %s1436_s30), 31  ;;  %351 = vst [vmem:[#allocation2] sm:$0xff] (!%p1442_p10), %v2034_v0  ;;  %352 = vst [vmem:[#allocation2 + $0x8] sm:$0xff] (!%p1442_p10), %v2034_v0 }
  0x63   : > { %s2227_s29 = scalar_lea.vmem %s2335_s1, %s1435_s11  ;;  %s1437_s26 = sshll.u32 %s330_s9, 2  ;;  %353 = vst [vmem:[#allocation2 + $0x10] sm:$0xff] (!%p1442_p10), %v2034_v0  ;;  %354 = vst [vmem:[#allocation2 + $0x18] sm:$0xff] (!%p1442_p10), %v2034_v0 }
  0x64   : > { %s2232_s28 = scalar_lea.vmem %s2336_s2, %s1437_s26  ;;  %s1439_s14 = sshll.u32 %s2377_s30, 3  ;;  %355 = vst [vmem:[#allocation2 + $0x20] sm:$0xff] (!%p1442_p10), %v2034_v0  ;;  %356 = vst [vmem:[#allocation2 + $0x28] sm:$0xff] (!%p1442_p10), %v2034_v0 }
  0x65   : > { %s1441_s22 = sshll.u32 %s2377_s30, 2  ;;  %s2237_s27 = scalar_lea.vmem %s2337_s3, %s1439_s14  ;;  %357 = vst [vmem:[#allocation2 + $0x30] sm:$0xff] (!%p1442_p10), %v2034_v0  ;;  %358 = vst [vmem:[#allocation2 + $0x38] sm:$0xff] (!%p1442_p10), %v2034_v0 }
  0x66   : > { %s2242_s23 = scalar_lea.vmem %s2339_s5, %s1441_s22  ;;  %350 = sbr.rel (%p1442_p10) target bundleno = 109 (0x6d), region = 52  ;;  %359 = vst [vmem:[#allocation2 + $0x40] sm:$0xff] (!%p1442_p10), %v2034_v0  ;;  %360 = vst [vmem:[#allocation2 + $0x48] sm:$0xff] (!%p1442_p10), %v2034_v0 }
  0x67   : > { %361 = vst [vmem:[#allocation2 + $0x50] sm:$0xff] (!%p1442_p10), %v2034_v0  ;;  %362 = vst [vmem:[#allocation2 + $0x58] sm:$0xff] (!%p1442_p10), %v2034_v0 }
  0x68   : > { %363 = vst [vmem:[#allocation2 + $0x60] sm:$0xff] (!%p1442_p10), %v2034_v0  ;;  %364 = vst [vmem:[#allocation2 + $0x68] sm:$0xff] (!%p1442_p10), %v2034_v0 }
  0x69   : > { %365 = vst [vmem:[#allocation2 + $0x70] sm:$0xff] (!%p1442_p10), %v2034_v0  ;;  %366 = vst [vmem:[#allocation2 + $0x78] sm:$0xff] (!%p1442_p10), %v2034_v0 }
  0x6d PF: > { %v1831_v1 = vld [vmem:[%s2227_s29 + $0x40] sm:$0xff]   ;;  %v1833_v3 = vld [vmem:[%s2227_s29 + $0x48] sm:$0xff]   ;;  %v1835_v5 = vld [vmem:[%s2227_s29 + $0x50] sm:$0xff]   ;;  %p1475_p3 = scmp.ne.s32.totalorder %s2009_s21, 1 }
  0x6e   : > { %v1832_v2 = vld [vmem:[%s2227_s29] sm:$0xff]   ;;  %1582 = vmatprep.subr.bf16.mxu0 %v1831_v1  ;;  %1710 = vmatprep.subr.bf16.mxu1 %v1831_v1  ;;  %v1834_v4 = vld [vmem:[%s2227_s29 + $0x8] sm:$0xff]   ;;  %v1836_v6 = vld [vmem:[%s2227_s29 + $0x10] sm:$0xff]  }
  0x6f   : > { %1583 = vmatpush3.bf16.msra.mxu0 %v1832_v2  ;;  %1718 = vmatpush3.bf16.msra.mxu1 %v1832_v2  ;;  %v1837_v7 = vld [vmem:[%s2227_s29 + $0x58] sm:$0xff]   ;;  %v1839_v9 = vld [vmem:[%s2227_s29 + $0x60] sm:$0xff]   ;;  %v1841_v11 = vld [vmem:[%s2227_s29 + $0x68] sm:$0xff]  }
  0x70   : > { %1584 = vmatprep.subr.bf16.mxu0 %v1833_v3  ;;  %1711 = vmatprep.subr.bf16.mxu1 %v1833_v3  ;;  %v1838_v8 = vld [vmem:[%s2227_s29 + $0x18] sm:$0xff]   ;;  %v1840_v10 = vld [vmem:[%s2227_s29 + $0x20] sm:$0xff]   ;;  %v1842_v14 = vld [vmem:[%s2227_s29 + $0x28] sm:$0xff]  }
  0x71   : > { %v1849_v12 = vld [vmem:[%s2212_s18 + $0x4] ss:$8 sps:$4 sm:$0xff]   ;;  %v1843_v15 = vld [vmem:[%s2227_s29 + $0x70] sm:$0xff]   ;;  %v1845_v17 = vld [vmem:[%s2227_s29 + $0x78] sm:$0xff]  }
  0x72   : > { %v1852_v13 = vld [vmem:[%s2212_s18 + $0x44] ss:$8 sps:$4 sm:$0xff]   ;;  %639 = vmatprep.mubr.bf16.mxu0 %v1849_v12  ;;  %v1844_v16 = vld [vmem:[%s2227_s29 + $0x30] sm:$0xff]   ;;  %v1846_v18 = vld [vmem:[%s2227_s29 + $0x38] sm:$0xff]  }
  0x73   : > { %1585 = vmatpush3.bf16.msra.mxu0 %v1834_v4  ;;  %1719 = vmatpush3.bf16.msra.mxu1 %v1834_v4  ;;  %v1847_v19 = vld [vmem:[%s2212_s18] ss:$8 sps:$4 sm:$0xff]   ;;  %v1853_v21 = vld [vmem:[%s2212_s18 + $0x14] ss:$8 sps:$4 sm:$0xff]   ;;  %v1857_v23 = vld [vmem:[%s2212_s18 + $0x10] ss:$8 sps:$4 sm:$0xff]  }
  0x74   : > { %1586 = vmatprep.subr.bf16.mxu0 %v1835_v5  ;;  %1712 = vmatprep.subr.bf16.mxu1 %v1835_v5  ;;  %v1850_v20 = vld [vmem:[%s2212_s18 + $0x40] ss:$8 sps:$4 sm:$0xff]   ;;  %v1855_v22 = vld [vmem:[%s2212_s18 + $0x54] ss:$8 sps:$4 sm:$0xff]   ;;  %v1858_v24 = vld [vmem:[%s2212_s18 + $0x50] ss:$8 sps:$4 sm:$0xff]  }
  0x75   : > { %671 = vmatprep.mubr.bf16.mxu1 %v1852_v13  ;;  %v1859_v25 = vld [vmem:[%s2212_s18 + $0x24] ss:$8 sps:$4 sm:$0xff]   ;;  %v1863_v27 = vld [vmem:[%s2212_s18 + $0x20] ss:$8 sps:$4 sm:$0xff]   ;;  %v1865_v29 = vld [vmem:[%s2212_s18 + $0x34] ss:$8 sps:$4 sm:$0xff]  }
  0x76   : > { %v1861_v26 = vld [vmem:[%s2212_s18 + $0x64] ss:$8 sps:$4 sm:$0xff]   ;;  %v1864_v28 = vld [vmem:[%s2212_s18 + $0x60] ss:$8 sps:$4 sm:$0xff]   ;;  %v1867_v30 = vld [vmem:[%s2212_s18 + $0x74] ss:$8 sps:$4 sm:$0xff]  }
  0x77   : > { %1587 = vmatpush3.bf16.msra.mxu0 %v1836_v6  ;;  %1720 = vmatpush3.bf16.msra.mxu1 %v1836_v6  ;;  %v1869_v31 = vld [vmem:[%s2212_s18 + $0x30] ss:$8 sps:$4 sm:$0xff]   ;;  %v367_v35 = vld [vmem:[#allocation2] sm:$0xff]  ;;  %v368_v43 = vld [vmem:[#allocation2 + $0x8] sm:$0xff] }
  0x78   : > { %1588 = vmatprep.subr.bf16.mxu0 %v1837_v7  ;;  %1713 = vmatprep.subr.bf16.mxu1 %v1837_v7  ;;  %v1870_v32 = vld [vmem:[%s2212_s18 + $0x70] ss:$8 sps:$4 sm:$0xff]   ;;  %v375_v37 = vld [vmem:[#allocation2 + $0x40] sm:$0xff]  ;;  %v376_v45 = vld [vmem:[#allocation2 + $0x48] sm:$0xff] }
  0x79   : > { %v369_v55 = vld [vmem:[#allocation2 + $0x10] sm:$0xff]  ;;  %v370_v63 = vld [vmem:[#allocation2 + $0x18] sm:$0xff]  ;;  %v379_v13 = vld [vmem:[#allocation2 + $0x60] sm:$0xff] }
  0x7a   : > { %v377_v57 = vld [vmem:[#allocation2 + $0x50] sm:$0xff]  ;;  %v378_v1 = vld [vmem:[#allocation2 + $0x58] sm:$0xff] }
  0x7b   : > { %1589 = vmatpush3.bf16.msra.mxu0 %v1838_v8  ;;  %1721 = vmatpush3.bf16.msra.mxu1 %v1838_v8 }
  0x7c   : > { %1590 = vmatprep.subr.bf16.mxu0 %v1839_v9  ;;  %1714 = vmatprep.subr.bf16.mxu1 %v1839_v9 }
  0x7f   : > { %1591 = vmatpush3.bf16.msra.mxu0 %v1840_v10  ;;  %1722 = vmatpush3.bf16.msra.mxu1 %v1840_v10 }
  0x80   : > { %1592 = vmatprep.subr.bf16.mxu0 %v1841_v11  ;;  %1715 = vmatprep.subr.bf16.mxu1 %v1841_v11  ;;  %v371_v11 = vld [vmem:[#allocation2 + $0x20] sm:$0xff] }
  0x83   : > { %1593 = vmatpush3.bf16.msra.mxu0 %v1842_v14  ;;  %1723 = vmatpush3.bf16.msra.mxu1 %v1842_v14 }
  0x84   : > { %1594 = vmatprep.subr.bf16.mxu0 %v1843_v15  ;;  %1716 = vmatprep.subr.bf16.mxu1 %v1843_v15 }
  0x87   : > { %1595 = vmatpush3.bf16.msra.mxu0 %v1844_v16  ;;  %1724 = vmatpush3.bf16.msra.mxu1 %v1844_v16 }
  0x88   : > { %1596 = vmatprep.subr.bf16.mxu0 %v1845_v17  ;;  %1717 = vmatprep.subr.bf16.mxu1 %v1845_v17 }
  0x8b   : > { %1597 = vmatpush3.bf16.msra.mxu0 %v1846_v18  ;;  %1725 = vmatpush3.bf16.msra.mxu1 %v1846_v18 }
  0x8e   : > { %640 = vmatmul.mubr.bf16.vlgmr.msra.gmra.mrb[0].mxu0 %v1847_v19  ;;  %672 = vmatmul.mubr.bf16.vlgmr.msra.gmra.mrb[0].mxu1 %v1850_v20  ;;  %v372_v19 = vld [vmem:[#allocation2 + $0x28] sm:$0xff] }
  0x8f   : > { %647 = vmatprep.mubr.bf16.mxu0 %v1853_v21  ;;  %679 = vmatprep.mubr.bf16.mxu1 %v1855_v22  ;;  %v380_v21 = vld [vmem:[#allocation2 + $0x68] sm:$0xff] }
  0x96   : > { %648 = vmatmul.mubr.bf16.gmra.mrb[4].mxu0 %v1857_v23  ;;  %680 = vmatmul.mubr.bf16.gmra.mrb[4].mxu1 %v1858_v24 }
  0x97   : > { %655 = vmatprep.mubr.bf16.mxu0 %v1859_v25  ;;  %687 = vmatprep.mubr.bf16.mxu1 %v1861_v26 }
  0x9e   : > { %656 = vmatmul.mubr.bf16.gmra.mrb[8].mxu0 %v1863_v27  ;;  %688 = vmatmul.mubr.bf16.gmra.mrb[8].mxu1 %v1864_v28 }
  0x9f   : > { %663 = vmatprep.mubr.bf16.mxu0 %v1865_v29  ;;  %695 = vmatprep.mubr.bf16.mxu1 %v1867_v30 }
  0xa6   : > { %664 = vmatmul.mubr.bf16.gmra.mrb[12].mxu0 %v1869_v31  ;;  %696 = vmatmul.mubr.bf16.gmra.mrb[12].mxu1 %v1870_v32  ;;  %v373_v31 = vld [vmem:[#allocation2 + $0x30] sm:$0xff] }
 0x161   : > { %v1598_v33 = vpop.f32.mrb[0].mxu0  ;;  %v1622_v34 = vpop.f32.mrb[0].mxu1 }
 0x162   : > { %v1599_v36 = vpop.f32.mrb[1].mxu0  ;;  %v1623_v38 = vpop.f32.mrb[1].mxu1 }
 0x163   : > { %v1600_v39 = vadd.f32 %v1599_v36, %v1598_v33  ;;  %v1624_v40 = vadd.f32 %v1623_v38, %v1622_v34  ;;  %v1601_v41 = vpop.f32.mrb[2].mxu0  ;;  %v1625_v42 = vpop.f32.mrb[2].mxu1  ;;  %v381_v33 = vld [vmem:[#allocation2 + $0x70] sm:$0xff] }
 0x164   : > { %v1602_v44 = vpop.f32.mrb[3].mxu0  ;;  %v1626_v46 = vpop.f32.mrb[3].mxu1 }
 0x165   : > { %v704_v47 = vadd.f32 %v1600_v39, %v367_v35  ;;  %v712_v48 = vadd.f32 %v1624_v40, %v375_v37  ;;  %v1603_v49 = vadd.f32 %v1602_v44, %v1601_v41  ;;  %v1627_v50 = vadd.f32 %v1626_v46, %v1625_v42  ;;  %v374_v39 = vld [vmem:[#allocation2 + $0x38] sm:$0xff] }
 0x166   : > { %v382_v41 = vld [vmem:[#allocation2 + $0x78] sm:$0xff] }
 0x167   : > { %720 = vst [vmem:[#allocation2] sm:$0xff] %v704_v47  ;;  %728 = vst [vmem:[#allocation2 + $0x40] sm:$0xff] %v712_v48  ;;  %v705_v51 = vadd.f32 %v1603_v49, %v368_v43  ;;  %v713_v52 = vadd.f32 %v1627_v50, %v376_v45  ;;  %v764_v49 = vld [vmem:[%s2237_s27 + $0x40] sm:$0xff] (!%p1475_p3) }
 0x168   : > { %v756_v50 = vld [vmem:[%s2237_s27] sm:$0xff] (!%p1475_p3) }
 0x169   : > { %721 = vst [vmem:[#allocation2 + $0x8] sm:$0xff] %v705_v51  ;;  %729 = vst [vmem:[#allocation2 + $0x48] sm:$0xff] %v713_v52  ;;  %v1604_v53 = vpop.f32.mrb[4].mxu0  ;;  %v1628_v54 = vpop.f32.mrb[4].mxu1  ;;  %v2035_v51 = vmov (!%p1475_p3), 0   ;;  %v765_v52 = vld [vmem:[%s2237_s27 + $0x48] sm:$0xff] (!%p1475_p3) }
 0x16a   : > { %v1605_v56 = vpop.f32.mrb[5].mxu0  ;;  %v1629_v58 = vpop.f32.mrb[5].mxu1  ;;  %1872 = vset.pattern.permute.xlu1 (!%p1475_p3), %v2035_v51  ;;  %1871 = vset.pattern.permute.xlu0 (!%p1475_p3), %v2035_v51 }
 0x16b   : > { %v1606_v59 = vadd.f32 %v1605_v56, %v1604_v53  ;;  %v1630_v60 = vadd.f32 %v1629_v58, %v1628_v54  ;;  %v1607_v61 = vpop.f32.mrb[6].mxu0  ;;  %v1631_v62 = vpop.f32.mrb[6].mxu1  ;;  %814 = vperm.xlu1 (!%p1475_p3), %1872, %v764_v49   ;;  %774 = vperm.xlu0 (!%p1475_p3), %1871, %v756_v50   ;;  %v757_v53 = vld [vmem:[%s2237_s27 + $0x8] sm:$0xff] (!%p1475_p3)  ;;  %v759_v54 = vld [vmem:[%s2237_s27 + $0x18] sm:$0xff] (!%p1475_p3)  ;;  %v1873_v56 = vld [vmem:[#allocation6 + $0x40] sm:$0xff] (!%p1475_p3)  }
 0x16c   : > { %v1608_v0 = vpop.f32.mrb[7].mxu0  ;;  %v1632_v2 = vpop.f32.mrb[7].mxu1  ;;  %1646 = vmatprep.subr.bf16.mxu0 (!%p1475_p3), %v1873_v56  ;;  %1726 = vmatprep.subr.bf16.mxu1 (!%p1475_p3), %v1873_v56  ;;  %v1875_v58 = vld [vmem:[#allocation6 + $0x48] sm:$0xff] (!%p1475_p3)   ;;  %v1894_v49 = vld [vmem:[%s2232_s28 + $0x30] sm:$0xff] (!%p1475_p3)  }
 0x16d   : > { %v706_v3 = vadd.f32 %v1606_v59, %v369_v55  ;;  %v714_v4 = vadd.f32 %v1630_v60, %v377_v57  ;;  %v1609_v5 = vadd.f32 %v1608_v0, %v1607_v61  ;;  %v1633_v6 = vadd.f32 %v1632_v2, %v1631_v62  ;;  %v758_v55 = vld [vmem:[%s2237_s27 + $0x10] sm:$0xff] (!%p1475_p3)  ;;  %v1874_v57 = vld [vmem:[#allocation6] sm:$0xff] (!%p1475_p3)   ;;  %v767_v59 = vld [vmem:[%s2237_s27 + $0x58] sm:$0xff] (!%p1475_p3) }
 0x16e   : > { %1647 = vmatpush3.bf16.msra.mxu0 (!%p1475_p3), %v1874_v57  ;;  %1734 = vmatpush3.bf16.msra.mxu1 (!%p1475_p3), %v1874_v57  ;;  %v1876_v60 = vld [vmem:[#allocation6 + $0x8] sm:$0xff] (!%p1475_p3)   ;;  %v766_v61 = vld [vmem:[%s2237_s27 + $0x50] sm:$0xff] (!%p1475_p3)  ;;  %v1879_v2 = vld [vmem:[#allocation6 + $0x58] sm:$0xff] (!%p1475_p3)  }
 0x16f   : > { %722 = vst [vmem:[#allocation2 + $0x10] sm:$0xff] %v706_v3  ;;  %730 = vst [vmem:[#allocation2 + $0x50] sm:$0xff] %v714_v4  ;;  %v707_v7 = vadd.f32 %v1609_v5, %v370_v63  ;;  %v715_v8 = vadd.f32 %v1633_v6, %v378_v1  ;;  %819 = vperm.xlu1 (!%p1475_p3), %1872, %v765_v52   ;;  %779 = vperm.xlu0 (!%p1475_p3), %1871, %v757_v53   ;;  %v1877_v62 = vld [vmem:[#allocation6 + $0x50] sm:$0xff] (!%p1475_p3)   ;;  %v761_v63 = vld [vmem:[%s2237_s27 + $0x28] sm:$0xff] (!%p1475_p3) }
 0x170   : > { %1648 = vmatprep.subr.bf16.mxu0 (!%p1475_p3), %v1875_v58  ;;  %1727 = vmatprep.subr.bf16.mxu1 (!%p1475_p3), %v1875_v58  ;;  %v1878_v0 = vld [vmem:[#allocation6 + $0x10] sm:$0xff] (!%p1475_p3)   ;;  %v760_v1 = vld [vmem:[%s2237_s27 + $0x20] sm:$0xff] (!%p1475_p3)  ;;  %v769_v3 = vld [vmem:[%s2237_s27 + $0x68] sm:$0xff] (!%p1475_p3) }
 0x171   : > { %723 = vst [vmem:[#allocation2 + $0x18] sm:$0xff] %v707_v7  ;;  %731 = vst [vmem:[#allocation2 + $0x58] sm:$0xff] %v715_v8  ;;  %v1610_v9 = vpop.f32.mrb[8].mxu0  ;;  %v1634_v10 = vpop.f32.mrb[8].mxu1  ;;  %v1880_v4 = vld [vmem:[#allocation6 + $0x18] sm:$0xff] (!%p1475_p3)   ;;  %v768_v5 = vld [vmem:[%s2237_s27 + $0x60] sm:$0xff] (!%p1475_p3) }
 0x172   : > { %v1611_v12 = vpop.f32.mrb[9].mxu0  ;;  %v1635_v14 = vpop.f32.mrb[9].mxu1  ;;  %1649 = vmatpush3.bf16.msra.mxu0 (!%p1475_p3), %v1876_v60  ;;  %1735 = vmatpush3.bf16.msra.mxu1 (!%p1475_p3), %v1876_v60  ;;  %v1881_v6 = vld [vmem:[#allocation6 + $0x60] sm:$0xff] (!%p1475_p3)   ;;  %v763_v7 = vld [vmem:[%s2237_s27 + $0x38] sm:$0xff] (!%p1475_p3) }
 0x173   : > { %v1612_v15 = vadd.f32 %v1611_v12, %v1610_v9  ;;  %v1636_v16 = vadd.f32 %v1635_v14, %v1634_v10  ;;  %v1613_v17 = vpop.f32.mrb[10].mxu0  ;;  %v1637_v18 = vpop.f32.mrb[10].mxu1  ;;  %789 = vperm.xlu1 (!%p1475_p3), %1872, %v759_v54   ;;  %784 = vperm.xlu0 (!%p1475_p3), %1871, %v758_v55   ;;  %v1882_v8 = vld [vmem:[#allocation6 + $0x20] sm:$0xff] (!%p1475_p3)   ;;  %v762_v9 = vld [vmem:[%s2237_s27 + $0x30] sm:$0xff] (!%p1475_p3)  ;;  %v1883_v10 = vld [vmem:[#allocation6 + $0x68] sm:$0xff] (!%p1475_p3)  }
 0x174   : > { %v1614_v20 = vpop.f32.mrb[11].mxu0  ;;  %v1638_v22 = vpop.f32.mrb[11].mxu1  ;;  %1650 = vmatprep.subr.bf16.mxu0 (!%p1475_p3), %v1877_v62  ;;  %1728 = vmatprep.subr.bf16.mxu1 (!%p1475_p3), %v1877_v62  ;;  %v1890_v12 = vld [vmem:[%s2232_s28 + $0x20] sm:$0xff] (!%p1475_p3)   ;;  %v771_v14 = vld [vmem:[%s2237_s27 + $0x78] sm:$0xff] (!%p1475_p3) }
 0x175   : > { %v708_v23 = vadd.f32 %v1612_v15, %v371_v11  ;;  %v716_v24 = vadd.f32 %v1636_v16, %v379_v13  ;;  %v1615_v25 = vadd.f32 %v1614_v20, %v1613_v17  ;;  %v1639_v26 = vadd.f32 %v1638_v22, %v1637_v18  ;;  %v1889_v11 = vld [vmem:[%s2232_s28] sm:$0xff] (!%p1475_p3)   ;;  %v1884_v13 = vld [vmem:[#allocation6 + $0x28] sm:$0xff] (!%p1475_p3)   ;;  %v770_v15 = vld [vmem:[%s2237_s27 + $0x70] sm:$0xff] (!%p1475_p3)  ;;  %1164 = vmatprep.mubr.bf16.mxu1 (!%p1475_p3), %v1890_v12 }
 0x176   : > { %1651 = vmatpush3.bf16.msra.mxu0 (!%p1475_p3), %v1878_v0  ;;  %1736 = vmatpush3.bf16.msra.mxu1 (!%p1475_p3), %v1878_v0  ;;  %v1885_v16 = vld [vmem:[#allocation6 + $0x70] sm:$0xff] (!%p1475_p3)   ;;  %v1887_v18 = vld [vmem:[#allocation6 + $0x78] sm:$0xff] (!%p1475_p3)   ;;  %v748_v22 = vld [vmem:[#allocation2 + $0x40] sm:$0xff] (!%p1475_p3) }
 0x177   : > { %724 = vst [vmem:[#allocation2 + $0x20] sm:$0xff] %v708_v23  ;;  %732 = vst [vmem:[#allocation2 + $0x60] sm:$0xff] %v716_v24  ;;  %v709_v27 = vadd.f32 %v1615_v25, %v372_v19  ;;  %v717_v28 = vadd.f32 %v1639_v26, %v380_v21  ;;  %829 = vperm.xlu1 (!%p1475_p3), %1872, %v767_v59   ;;  %824 = vperm.xlu0 (!%p1475_p3), %1871, %v766_v61   ;;  %v1886_v17 = vld [vmem:[#allocation6 + $0x30] sm:$0xff] (!%p1475_p3)   ;;  %v1888_v19 = vld [vmem:[#allocation6 + $0x38] sm:$0xff] (!%p1475_p3)  }
 0x178   : > { %1652 = vmatprep.subr.bf16.mxu0 (!%p1475_p3), %v1879_v2  ;;  %1729 = vmatprep.subr.bf16.mxu1 (!%p1475_p3), %v1879_v2  ;;  %v740_v23 = vld [vmem:[#allocation2] sm:$0xff] (!%p1475_p3)  ;;  %v749_v24 = vld [vmem:[#allocation2 + $0x48] sm:$0xff] (!%p1475_p3)  ;;  %v1895_v0 = vld [vmem:[%s2232_s28 + $0x18] sm:$0xff] (!%p1475_p3)  }
 0x179   : > { %725 = vst [vmem:[#allocation2 + $0x28] sm:$0xff] %v709_v27  ;;  %733 = vst [vmem:[#allocation2 + $0x68] sm:$0xff] %v717_v28  ;;  %v1616_v29 = vpop.f32.mrb[12].mxu0  ;;  %v1640_v30 = vpop.f32.mrb[12].mxu1  ;;  %1132 = vmatprep.mubr.bf16.mxu0 (!%p1475_p3), %v1889_v11  ;;  %v741_v25 = vld [vmem:[#allocation2 + $0x8] sm:$0xff] (!%p1475_p3) }
 0x17a   : > { %v1617_v32 = vpop.f32.mrb[13].mxu0  ;;  %v1641_v34 = vpop.f32.mrb[13].mxu1  ;;  %1653 = vmatpush3.bf16.msra.mxu0 (!%p1475_p3), %v1880_v4  ;;  %1737 = vmatpush3.bf16.msra.mxu1 (!%p1475_p3), %v1880_v4 }
 0x17b   : > { %v1618_v35 = vadd.f32 %v1617_v32, %v1616_v29  ;;  %v1642_v36 = vadd.f32 %v1641_v34, %v1640_v30  ;;  %v1619_v37 = vpop.f32.mrb[14].mxu0  ;;  %v1643_v38 = vpop.f32.mrb[14].mxu1  ;;  %739 = sbr.rel (%p1475_p3) target bundleno = 745 (0x2e9), region = 56  ;;  %799 = vperm.xlu1 (!%p1475_p3), %1872, %v761_v63   ;;  %794 = vperm.xlu0 (!%p1475_p3), %1871, %v760_v1   ;;  %v1891_v32 = vld [vmem:[%s2232_s28 + $0x8] sm:$0xff] (!%p1475_p3)   ;;  %v1896_v1 = vld [vmem:[%s2232_s28 + $0x38] sm:$0xff] (!%p1475_p3)  }
 0x17c   : > { %v1620_v40 = vpop.f32.mrb[15].mxu0  ;;  %v1644_v42 = vpop.f32.mrb[15].mxu1  ;;  %1654 = vmatprep.subr.bf16.mxu0 (!%p1475_p3), %v1881_v6  ;;  %1730 = vmatprep.subr.bf16.mxu1 (!%p1475_p3), %v1881_v6 }
 0x17d   : > { %v710_v43 = vadd.f32 %v1618_v35, %v373_v31  ;;  %v718_v44 = vadd.f32 %v1642_v36, %v381_v33  ;;  %v1621_v45 = vadd.f32 %v1620_v40, %v1619_v37  ;;  %v1645_v46 = vadd.f32 %v1644_v42, %v1643_v38  ;;  %v1892_v33 = vld [vmem:[%s2232_s28 + $0x28] sm:$0xff] (!%p1475_p3)   ;;  %v743_v37 = vld [vmem:[#allocation2 + $0x18] sm:$0xff] (!%p1475_p3) }
 0x17e   : > { %1655 = vmatpush3.bf16.msra.mxu0 (!%p1475_p3), %v1882_v8  ;;  %1738 = vmatpush3.bf16.msra.mxu1 (!%p1475_p3), %v1882_v8  ;;  %v751_v40 = vld [vmem:[#allocation2 + $0x58] sm:$0xff] (!%p1475_p3)  ;;  %v744_v55 = vld [vmem:[#allocation2 + $0x20] sm:$0xff] (!%p1475_p3) }
 0x17f   : > { %726 = vst [vmem:[#allocation2 + $0x30] sm:$0xff] %v710_v43  ;;  %734 = vst [vmem:[#allocation2 + $0x70] sm:$0xff] %v718_v44  ;;  %v711_v47 = vadd.f32 %v1621_v45, %v374_v39  ;;  %v719_v48 = vadd.f32 %v1645_v46, %v382_v41  ;;  %839 = vperm.xlu1 (!%p1475_p3), %1872, %v769_v3   ;;  %834 = vperm.xlu0 (!%p1475_p3), %1871, %v768_v5   ;;  %v742_v39 = vld [vmem:[#allocation2 + $0x10] sm:$0xff] (!%p1475_p3)  ;;  %v752_v57 = vld [vmem:[#allocation2 + $0x60] sm:$0xff] (!%p1475_p3) }
 0x180   : > { %1656 = vmatprep.subr.bf16.mxu0 (!%p1475_p3), %v1883_v10  ;;  %1731 = vmatprep.subr.bf16.mxu1 (!%p1475_p3), %v1883_v10  ;;  %v750_v41 = vld [vmem:[#allocation2 + $0x50] sm:$0xff] (!%p1475_p3)  ;;  %v745_v53 = vld [vmem:[#allocation2 + $0x28] sm:$0xff] (!%p1475_p3) }
 0x181   : > { %727 = vst [vmem:[#allocation2 + $0x38] sm:$0xff] %v711_v47  ;;  %735 = vst [vmem:[#allocation2 + $0x78] sm:$0xff] %v719_v48  ;;  %v1893_v48 = vld [vmem:[%s2232_s28 + $0x10] sm:$0xff] (!%p1475_p3)   ;;  %v753_v56 = vld [vmem:[#allocation2 + $0x68] sm:$0xff] (!%p1475_p3) }
 0x182   : > { %1657 = vmatpush3.bf16.msra.mxu0 %v1884_v13  ;;  %1739 = vmatpush3.bf16.msra.mxu1 %v1884_v13 }
 0x183   : > { %809 = vperm.xlu1 %1872, %v763_v7   ;;  %804 = vperm.xlu0 %1871, %v762_v9  }
 0x184   : > { %1658 = vmatprep.subr.bf16.mxu0 %v1885_v16  ;;  %1732 = vmatprep.subr.bf16.mxu1 %v1885_v16 }
 0x186   : > { %1659 = vmatpush3.bf16.msra.mxu0 %v1886_v17  ;;  %1740 = vmatpush3.bf16.msra.mxu1 %v1886_v17  ;;  %v746_v7 = vld [vmem:[#allocation2 + $0x30] sm:$0xff] }
 0x187   : > { %849 = vperm.xlu1 %1872, %v771_v14   ;;  %844 = vperm.xlu0 %1871, %v770_v15   ;;  %v754_v9 = vld [vmem:[#allocation2 + $0x70] sm:$0xff] }
 0x188   : > { %1660 = vmatprep.subr.bf16.mxu0 %v1887_v18  ;;  %1733 = vmatprep.subr.bf16.mxu1 %v1887_v18  ;;  %v747_v5 = vld [vmem:[#allocation2 + $0x38] sm:$0xff] }
 0x189   : > { %v755_v8 = vld [vmem:[#allocation2 + $0x78] sm:$0xff] }
 0x18a   : > { %1661 = vmatpush3.bf16.msra.mxu0 %v1888_v19  ;;  %1741 = vmatpush3.bf16.msra.mxu1 %v1888_v19 }
 0x1ea   : > { %v815_v20 = vpop.permute.xlu1 %814  ;;  %v775_v21 = vpop.permute.xlu0 %774 }
 0x1eb   : > { %v860_v28 = vmul.f32 %v815_v20, %v748_v22  ;;  %v852_v29 = vmul.f32 %v775_v21, %v740_v23 }
 0x1ee   : > { %v820_v26 = vpop.permute.xlu1 %819  ;;  %v780_v27 = vpop.permute.xlu0 %779 }
 0x1ef   : > { %v861_v30 = vmul.f32 %v820_v26, %v749_v24  ;;  %v853_v31 = vmul.f32 %v780_v27, %v741_v25 }
 0x1f1   : > { %v872_v34 = vpack.c.bf16 %v861_v30, %v860_v28  ;;  %v868_v35 = vpack.c.bf16 %v853_v31, %v852_v29 }
 0x1f2   : > { %v790_v36 = vpop.permute.xlu1 %789  ;;  %v785_v38 = vpop.permute.xlu0 %784 }
 0x1f3   : > { %1133 = vmatmul.mubr.bf16.vlgmr.msra.gmra.mrb[0].mxu0 %v868_v35  ;;  %1165 = vmatmul.mubr.bf16.vlgmr.msra.gmra.mrb[0].mxu1 %v872_v34  ;;  %v855_v42 = vmul.f32 %v790_v36, %v743_v37  ;;  %v854_v43 = vmul.f32 %v785_v38, %v742_v39 }
 0x1f4   : > { %1140 = vmatprep.mubr.bf16.mxu0 %v1891_v32  ;;  %1172 = vmatprep.mubr.bf16.mxu1 %v1892_v33 }
 0x1f5   : > { %v869_v50 = vpack.c.bf16 %v855_v42, %v854_v43 }
 0x1f6   : > { %v830_v44 = vpop.permute.xlu1 %829  ;;  %v825_v45 = vpop.permute.xlu0 %824 }
 0x1f7   : > { %v863_v46 = vmul.f32 %v830_v44, %v751_v40  ;;  %v862_v47 = vmul.f32 %v825_v45, %v750_v41 }
 0x1f9   : > { %v873_v51 = vpack.c.bf16 %v863_v46, %v862_v47 }
 0x1fa   : > { %v800_v52 = vpop.permute.xlu1 %799  ;;  %v795_v54 = vpop.permute.xlu0 %794 }
 0x1fb   : > { %1141 = vmatmul.mubr.bf16.gmra.mrb[4].mxu0 %v869_v50  ;;  %1173 = vmatmul.mubr.bf16.gmra.mrb[4].mxu1 %v873_v51  ;;  %v857_v58 = vmul.f32 %v800_v52, %v745_v53  ;;  %v856_v59 = vmul.f32 %v795_v54, %v744_v55 }
 0x1fc   : > { %1148 = vmatprep.mubr.bf16.mxu0 %v1893_v48  ;;  %1180 = vmatprep.mubr.bf16.mxu1 %v1894_v49 }
 0x1fd   : > { %v870_v2 = vpack.c.bf16 %v857_v58, %v856_v59 }
 0x1fe   : > { %v840_v60 = vpop.permute.xlu1 %839  ;;  %v835_v61 = vpop.permute.xlu0 %834 }
 0x1ff   : > { %v865_v62 = vmul.f32 %v840_v60, %v753_v56  ;;  %v864_v63 = vmul.f32 %v835_v61, %v752_v57 }
 0x201   : > { %v874_v3 = vpack.c.bf16 %v865_v62, %v864_v63 }
 0x202   : > { %v810_v4 = vpop.permute.xlu1 %809  ;;  %v805_v6 = vpop.permute.xlu0 %804 }
 0x203   : > { %1149 = vmatmul.mubr.bf16.gmra.mrb[8].mxu0 %v870_v2  ;;  %1181 = vmatmul.mubr.bf16.gmra.mrb[8].mxu1 %v874_v3  ;;  %v859_v10 = vmul.f32 %v810_v4, %v747_v5  ;;  %v858_v11 = vmul.f32 %v805_v6, %v746_v7 }
 0x204   : > { %1156 = vmatprep.mubr.bf16.mxu0 %v1895_v0  ;;  %1188 = vmatprep.mubr.bf16.mxu1 %v1896_v1 }
 0x205   : > { %v871_v16 = vpack.c.bf16 %v859_v10, %v858_v11 }
 0x206   : > { %v850_v12 = vpop.permute.xlu1 %849  ;;  %v845_v13 = vpop.permute.xlu0 %844 }
 0x207   : > { %v867_v14 = vmul.f32 %v850_v12, %v755_v8  ;;  %v866_v15 = vmul.f32 %v845_v13, %v754_v9 }
 0x209   : > { %v875_v17 = vpack.c.bf16 %v867_v14, %v866_v15 }
 0x20b   : > { %1157 = vmatmul.mubr.bf16.gmra.mrb[12].mxu0 %v871_v16  ;;  %1189 = vmatmul.mubr.bf16.gmra.mrb[12].mxu1 %v875_v17 }
 0x2c6   : > { %v1662_v18 = vpop.f32.mrb[0].mxu0  ;;  %v1686_v19 = vpop.f32.mrb[0].mxu1 }
 0x2c7   : > { %v1663_v20 = vpop.f32.mrb[1].mxu0  ;;  %v1687_v21 = vpop.f32.mrb[1].mxu1 }
 0x2c8   : > { %v1664_v22 = vadd.f32 %v1663_v20, %v1662_v18  ;;  %v1688_v23 = vadd.f32 %v1687_v21, %v1686_v19  ;;  %v1665_v24 = vpop.f32.mrb[2].mxu0  ;;  %v1689_v25 = vpop.f32.mrb[2].mxu1 }
 0x2c9   : > { %v1666_v26 = vpop.f32.mrb[3].mxu0  ;;  %v1690_v27 = vpop.f32.mrb[3].mxu1 }
 0x2ca   : > { %v1667_v28 = vadd.f32 %v1666_v26, %v1665_v24  ;;  %v1691_v29 = vadd.f32 %v1690_v27, %v1689_v25  ;;  %v1197_v30 = vmax.f32 %v1664_v22, 0.0  ;;  %v1205_v31 = vmax.f32 %v1688_v23, 0.0 }
 0x2cc   : > { %v1198_v32 = vmax.f32 %v1667_v28, 0.0  ;;  %v1206_v33 = vmax.f32 %v1691_v29, 0.0 }
 0x2ce   : > { %v1538_v34 = vpack.c.bf16 %v1198_v32, %v1197_v30  ;;  %v1558_v35 = vpack.c.bf16 %v1206_v33, %v1205_v31  ;;  %v1668_v36 = vpop.f32.mrb[4].mxu0  ;;  %v1692_v37 = vpop.f32.mrb[4].mxu1 }
 0x2cf   : > { %v1669_v38 = vpop.f32.mrb[5].mxu0  ;;  %v1693_v39 = vpop.f32.mrb[5].mxu1 }
 0x2d0   : > { %1539 = vst [vmem:[%s2242_s23] sm:$0xff] %v1538_v34   ;;  %1578 = vst [vmem:[%s2242_s23 + $0x20] sm:$0xff] %v1558_v35   ;;  %v1670_v40 = vadd.f32 %v1669_v38, %v1668_v36  ;;  %v1694_v41 = vadd.f32 %v1693_v39, %v1692_v37  ;;  %v1671_v42 = vpop.f32.mrb[6].mxu0  ;;  %v1695_v43 = vpop.f32.mrb[6].mxu1 }
 0x2d1   : > { %v1672_v44 = vpop.f32.mrb[7].mxu0  ;;  %v1696_v45 = vpop.f32.mrb[7].mxu1 }
 0x2d2   : > { %v1673_v46 = vadd.f32 %v1672_v44, %v1671_v42  ;;  %v1697_v47 = vadd.f32 %v1696_v45, %v1695_v43  ;;  %v1199_v48 = vmax.f32 %v1670_v40, 0.0  ;;  %v1207_v49 = vmax.f32 %v1694_v41, 0.0 }
 0x2d4   : > { %v1200_v50 = vmax.f32 %v1673_v46, 0.0  ;;  %v1208_v51 = vmax.f32 %v1697_v47, 0.0 }
 0x2d6   : > { %v1543_v52 = vpack.c.bf16 %v1200_v50, %v1199_v48  ;;  %v1563_v53 = vpack.c.bf16 %v1208_v51, %v1207_v49  ;;  %v1674_v54 = vpop.f32.mrb[8].mxu0  ;;  %v1698_v55 = vpop.f32.mrb[8].mxu1 }
 0x2d7   : > { %v1675_v56 = vpop.f32.mrb[9].mxu0  ;;  %v1699_v57 = vpop.f32.mrb[9].mxu1 }
 0x2d8   : > { %1575 = vst [vmem:[%s2242_s23 + $0x8] sm:$0xff] %v1543_v52   ;;  %1579 = vst [vmem:[%s2242_s23 + $0x28] sm:$0xff] %v1563_v53   ;;  %v1676_v58 = vadd.f32 %v1675_v56, %v1674_v54  ;;  %v1700_v59 = vadd.f32 %v1699_v57, %v1698_v55  ;;  %v1677_v60 = vpop.f32.mrb[10].mxu0  ;;  %v1701_v61 = vpop.f32.mrb[10].mxu1 }
 0x2d9   : > { %v1678_v62 = vpop.f32.mrb[11].mxu0  ;;  %v1702_v63 = vpop.f32.mrb[11].mxu1 }
 0x2da   : > { %v1679_v0 = vadd.f32 %v1678_v62, %v1677_v60  ;;  %v1703_v1 = vadd.f32 %v1702_v63, %v1701_v61  ;;  %v1201_v2 = vmax.f32 %v1676_v58, 0.0  ;;  %v1209_v3 = vmax.f32 %v1700_v59, 0.0 }
 0x2dc   : > { %v1202_v4 = vmax.f32 %v1679_v0, 0.0  ;;  %v1210_v5 = vmax.f32 %v1703_v1, 0.0 }
 0x2de   : > { %v1548_v6 = vpack.c.bf16 %v1202_v4, %v1201_v2  ;;  %v1568_v7 = vpack.c.bf16 %v1210_v5, %v1209_v3  ;;  %v1680_v8 = vpop.f32.mrb[12].mxu0  ;;  %v1704_v9 = vpop.f32.mrb[12].mxu1 }
 0x2df   : > { %v1681_v10 = vpop.f32.mrb[13].mxu0  ;;  %v1705_v11 = vpop.f32.mrb[13].mxu1 }
 0x2e0   : > { %1576 = vst [vmem:[%s2242_s23 + $0x10] sm:$0xff] %v1548_v6   ;;  %1580 = vst [vmem:[%s2242_s23 + $0x30] sm:$0xff] %v1568_v7   ;;  %v1682_v12 = vadd.f32 %v1681_v10, %v1680_v8  ;;  %v1706_v13 = vadd.f32 %v1705_v11, %v1704_v9  ;;  %v1683_v14 = vpop.f32.mrb[14].mxu0  ;;  %v1707_v15 = vpop.f32.mrb[14].mxu1 }
 0x2e1   : > { %v1684_v16 = vpop.f32.mrb[15].mxu0  ;;  %v1708_v17 = vpop.f32.mrb[15].mxu1 }
 0x2e2   : > { %v1685_v18 = vadd.f32 %v1684_v16, %v1683_v14  ;;  %v1709_v19 = vadd.f32 %v1708_v17, %v1707_v15  ;;  %v1203_v20 = vmax.f32 %v1682_v12, 0.0  ;;  %v1211_v21 = vmax.f32 %v1706_v13, 0.0 }
 0x2e4   : > { %v1204_v22 = vmax.f32 %v1685_v18, 0.0  ;;  %v1212_v23 = vmax.f32 %v1709_v19, 0.0 }
 0x2e6   : > { %v1553_v24 = vpack.c.bf16 %v1204_v22, %v1203_v20  ;;  %v1573_v25 = vpack.c.bf16 %v1212_v23, %v1211_v21 }
 0x2e8   : > { %1577 = vst [vmem:[%s2242_s23 + $0x18] sm:$0xff] %v1553_v24   ;;  %1581 = vst [vmem:[%s2242_s23 + $0x38] sm:$0xff] %v1573_v25  }
 0x2e9 PF: > { %s19_s25 = sadd.s32 1, %s2025_s25   ;;  %s2361_s21 = sld [smem:[#allocation10_spill]] }
 0x2ea   : > { %p16_p6 = scmp.ge.s32.totalorder %s19_s25, 6   ;;  %s2362_s23 = sld [smem:[#allocation11_spill]] }
 0x2eb   : > { %s2363_s18 = smov %s2001_s19  ;;  %s2364_s19 = smov %s2005_s20 }
 0x2ec   : > { %s2365_s20 = smov %s2179_s17  ;;  %s2366_s22 = smov %s2021_s24 }
 0x2ed   : > { %s2367_s24 = smov %s2373_s12  ;;  %18 = sbr.rel (!%p16_p6) target bundleno = 8 (0x8), region = 101 }
 0x2f4   :  { %1315 = vsyncpa [#allocation5], 1 }
 0x2f5   :  { %1317 = vsyncpa [#allocation5 + $0x1], 1 }
 0x2f6   :  { %1318 = vsyncpa [#allocation7], 1 }

// kernel: graphsage_forward.3
= control target key start
LH: loop header
LB: loop body
LE: loop exit
PB: predicated region body
PF: predicated region fallthrough
CT: control target
= control target key end

     0   :  { %v1324_v2 = vmov 0   ;;  %s1586_s0 = inlined_call_operand.vmem [shape: bf16[128,256], index: 0, kind: input, shape index: {}]   ;;  %s1587_s1 = inlined_call_operand.vmem [shape: bf16[256,128], index: 1, kind: input, shape index: {}, may-alias: {1,2}]   ;;  %s1588_s2 = inlined_call_operand.vmem [shape: bf16[256,128], index: 2, kind: input, shape index: {}, may-alias: {1,2}]   ;;  %s1589_s3 = inlined_call_operand.vmem [shape: f32[128,1], index: 3, kind: input, shape index: {}]   ;;  %s1590_s4 = inlined_call_operand.vmem [shape: bf16[256,128], index: 4, kind: input, shape index: {}]   ;;  %s1591_s5 = inlined_call_operand.hbm [shape: bf16[128,128], index: 5, kind: output, shape index: {}]  }
   0x1   :  { %v1236_v0 = vld [vmem:[%s1587_s1 + $0x40] sm:$0xff]   ;;  %1234 = vset.pattern.permute.xlu0 %v1324_v2  ;;  %1235 = vset.pattern.permute.xlu1 %v1324_v2  ;;  %v1238_v3 = vld [vmem:[%s1587_s1 + $0x48] sm:$0xff]   ;;  %v1240_v5 = vld [vmem:[%s1587_s1 + $0x50] sm:$0xff]  }
   0x2   :  { %v1237_v1 = vld [vmem:[%s1587_s1] sm:$0xff]   ;;  %1102 = vmatprep.subr.bf16.mxu0 %v1236_v0  ;;  %v1239_v4 = vld [vmem:[%s1587_s1 + $0x8] sm:$0xff]   ;;  %v1241_v6 = vld [vmem:[%s1587_s1 + $0x10] sm:$0xff]  }
   0x3   :  { %1103 = vmatpush3.bf16.msra.mxu0 %v1237_v1  ;;  %v1242_v7 = vld [vmem:[%s1587_s1 + $0x58] sm:$0xff]   ;;  %v1244_v9 = vld [vmem:[%s1587_s1 + $0x60] sm:$0xff]   ;;  %v1246_v11 = vld [vmem:[%s1587_s1 + $0x68] sm:$0xff]  }
   0x4   :  { %1104 = vmatprep.subr.bf16.mxu0 %v1238_v3  ;;  %v1243_v8 = vld [vmem:[%s1587_s1 + $0x18] sm:$0xff]   ;;  %v1245_v10 = vld [vmem:[%s1587_s1 + $0x20] sm:$0xff]   ;;  %v1247_v13 = vld [vmem:[%s1587_s1 + $0x28] sm:$0xff]  }
   0x5   :  { %v1254_v12 = vld [vmem:[%s1586_s0 + $0x4] ss:$8 sps:$4 sm:$0xff]   ;;  %v1248_v14 = vld [vmem:[%s1587_s1 + $0x70] sm:$0xff]   ;;  %v1250_v16 = vld [vmem:[%s1587_s1 + $0x78] sm:$0xff]  }
   0x6   :  { %314 = vmatprep.mubr.bf16.mxu0 %v1254_v12  ;;  %v1249_v15 = vld [vmem:[%s1587_s1 + $0x30] sm:$0xff]   ;;  %v430_v17 = vld [vmem:[%s1589_s3] sm:$0xff]  ;;  %v1251_v18 = vld [vmem:[%s1587_s1 + $0x38] sm:$0xff]  }
   0x7   :  { %1105 = vmatpush3.bf16.msra.mxu0 %v1239_v4  ;;  %448 = vperm.xlu0 %1234, %v430_v17   ;;  %v432_v19 = vld [vmem:[%s1589_s3 + $0x10] sm:$0xff]  ;;  %v431_v20 = vld [vmem:[%s1589_s3 + $0x8] sm:$0xff]  ;;  %v433_v21 = vld [vmem:[%s1589_s3 + $0x18] sm:$0xff] }
   0x8   :  { %1106 = vmatprep.subr.bf16.mxu0 %v1240_v5  ;;  %458 = vperm.xlu1 %1235, %v432_v19   ;;  %v1252_v22 = vld [vmem:[%s1586_s0] ss:$8 sps:$4 sm:$0xff]   ;;  %v1255_v23 = vld [vmem:[%s1586_s0 + $0x14] ss:$8 sps:$4 sm:$0xff]   ;;  %v1257_v32 = vld [vmem:[%s1586_s0 + $0x10] ss:$8 sps:$4 sm:$0xff]  }
   0x9   :  { %v434_v24 = vld [vmem:[%s1589_s3 + $0x20] sm:$0xff]  ;;  %v435_v25 = vld [vmem:[%s1589_s3 + $0x28] sm:$0xff]  ;;  %v436_v28 = vld [vmem:[%s1589_s3 + $0x30] sm:$0xff] }
   0xa   :  { %v1276_v26 = vld [vmem:[%s1590_s4 + $0x40] sm:$0xff]   ;;  %v1278_v29 = vld [vmem:[%s1590_s4 + $0x48] sm:$0xff]   ;;  %v437_v30 = vld [vmem:[%s1589_s3 + $0x38] sm:$0xff] }
   0xb   :  { %1107 = vmatpush3.bf16.msra.mxu0 %v1241_v6  ;;  %453 = vperm.xlu0 %1234, %v431_v20   ;;  %v1277_v27 = vld [vmem:[%s1590_s4] sm:$0xff]   ;;  %v1279_v31 = vld [vmem:[%s1590_s4 + $0x8] sm:$0xff]   ;;  %v1280_v35 = vld [vmem:[%s1590_s4 + $0x50] sm:$0xff]  }
   0xc   :  { %1108 = vmatprep.subr.bf16.mxu0 %v1242_v7  ;;  %463 = vperm.xlu1 %1235, %v433_v21   ;;  %v1258_v33 = vld [vmem:[%s1586_s0 + $0x24] ss:$8 sps:$4 sm:$0xff]   ;;  %v1281_v36 = vld [vmem:[%s1590_s4 + $0x10] sm:$0xff]   ;;  %v1282_v39 = vld [vmem:[%s1590_s4 + $0x58] sm:$0xff]  }
   0xd   :  { %1166 = vmatprep.subr.bf16.mxu1 %v1276_v26  ;;  %v438_v34 = vld [vmem:[%s1589_s3 + $0x40] sm:$0xff]  ;;  %v439_v37 = vld [vmem:[%s1589_s3 + $0x48] sm:$0xff]  ;;  %v440_v38 = vld [vmem:[%s1589_s3 + $0x50] sm:$0xff] }
   0xe   :  { %1167 = vmatpush3.bf16.msra.mxu1 %v1277_v27  ;;  %v1283_v40 = vld [vmem:[%s1590_s4 + $0x18] sm:$0xff]   ;;  %v1260_v42 = vld [vmem:[%s1586_s0 + $0x20] ss:$8 sps:$4 sm:$0xff]   ;;  %v444_v49 = vld [vmem:[%s1589_s3 + $0x70] sm:$0xff] }
   0xf   :  { %1109 = vmatpush3.bf16.msra.mxu0 %v1243_v8  ;;  %468 = vperm.xlu0 %1234, %v434_v24   ;;  %v441_v41 = vld [vmem:[%s1589_s3 + $0x58] sm:$0xff]  ;;  %v442_v44 = vld [vmem:[%s1589_s3 + $0x60] sm:$0xff]  ;;  %v443_v47 = vld [vmem:[%s1589_s3 + $0x68] sm:$0xff] }
  0x10   :  { %1110 = vmatprep.subr.bf16.mxu0 %v1244_v9  ;;  %473 = vperm.xlu1 %1235, %v435_v25   ;;  %v1261_v43 = vld [vmem:[%s1586_s0 + $0x34] ss:$8 sps:$4 sm:$0xff]   ;;  %v1284_v45 = vld [vmem:[%s1590_s4 + $0x60] sm:$0xff]   ;;  %v1286_v48 = vld [vmem:[%s1590_s4 + $0x68] sm:$0xff]  }
  0x11   :  { %1168 = vmatprep.subr.bf16.mxu1 %v1278_v29  ;;  %v1285_v46 = vld [vmem:[%s1590_s4 + $0x20] sm:$0xff]   ;;  %v1287_v50 = vld [vmem:[%s1590_s4 + $0x28] sm:$0xff]  }
  0x12   :  { %1169 = vmatpush3.bf16.msra.mxu1 %v1279_v31 }
  0x13   :  { %1111 = vmatpush3.bf16.msra.mxu0 %v1245_v10  ;;  %478 = vperm.xlu0 %1234, %v436_v28  }
  0x14   :  { %1112 = vmatprep.subr.bf16.mxu0 %v1246_v11  ;;  %483 = vperm.xlu1 %1235, %v437_v30  }
  0x15   :  { %1170 = vmatprep.subr.bf16.mxu1 %v1280_v35 }
  0x16   :  { %1171 = vmatpush3.bf16.msra.mxu1 %v1281_v36 }
  0x17   :  { %1113 = vmatpush3.bf16.msra.mxu0 %v1247_v13  ;;  %488 = vperm.xlu0 %1234, %v438_v34  }
  0x18   :  { %1114 = vmatprep.subr.bf16.mxu0 %v1248_v14  ;;  %493 = vperm.xlu1 %1235, %v439_v37  }
  0x19   :  { %1172 = vmatprep.subr.bf16.mxu1 %v1282_v39 }
  0x1a   :  { %1173 = vmatpush3.bf16.msra.mxu1 %v1283_v40 }
  0x1b   :  { %1115 = vmatpush3.bf16.msra.mxu0 %v1249_v15  ;;  %498 = vperm.xlu0 %1234, %v440_v38  }
  0x1c   :  { %1116 = vmatprep.subr.bf16.mxu0 %v1250_v16  ;;  %503 = vperm.xlu1 %1235, %v441_v41  }
  0x1d   :  { %1174 = vmatprep.subr.bf16.mxu1 %v1284_v45 }
  0x1e   :  { %1175 = vmatpush3.bf16.msra.mxu1 %v1285_v46 }
  0x1f   :  { %1117 = vmatpush3.bf16.msra.mxu0 %v1251_v18  ;;  %508 = vperm.xlu0 %1234, %v442_v44  }
  0x20   :  { %513 = vperm.xlu1 %1235, %v443_v47  }
  0x22   :  { %315 = vmatmul.mubr.bf16.vlgmr.msra.gmra.mrb[0].mxu0 %v1252_v22 }
  0x23   :  { %322 = vmatprep.mubr.bf16.mxu0 %v1255_v23 }
  0x2a   :  { %323 = vmatmul.mubr.bf16.gmra.mrb[4].mxu0 %v1257_v32 }
  0x2b   :  { %330 = vmatprep.mubr.bf16.mxu0 %v1258_v33 }
  0x32   :  { %331 = vmatmul.mubr.bf16.gmra.mrb[8].mxu0 %v1260_v42 }
  0x33   :  { %338 = vmatprep.mubr.bf16.mxu0 %v1261_v43 }
  0x34   :  { %10 = vsyncpa [#allocation5], 0  ;;  %v445_v51 = vld [vmem:[%s1589_s3 + $0x78] sm:$0xff]  ;;  %1176 = vmatprep.subr.bf16.mxu1 %v1286_v48  ;;  %v1264_v53 = vld [vmem:[%s1586_s0 + $0x44] ss:$8 sps:$4 sm:$0xff]   ;;  %518 = vperm.xlu0 %1234, %v444_v49  }
  0x35   :  { %v1263_v52 = vld [vmem:[%s1586_s0 + $0x30] ss:$8 sps:$4 sm:$0xff]   ;;  %523 = vperm.xlu1 %1235, %v445_v51   ;;  %1177 = vmatpush3.bf16.msra.mxu1 %v1287_v50  ;;  %v1266_v54 = vld [vmem:[%s1586_s0 + $0x40] ss:$8 sps:$4 sm:$0xff]   ;;  %v1267_v55 = vld [vmem:[%s1586_s0 + $0x54] ss:$8 sps:$4 sm:$0xff]  }
  0x36   :  { %v1269_v56 = vld [vmem:[%s1586_s0 + $0x50] ss:$8 sps:$4 sm:$0xff]   ;;  %v1270_v57 = vld [vmem:[%s1586_s0 + $0x64] ss:$8 sps:$4 sm:$0xff]   ;;  %v1272_v58 = vld [vmem:[%s1586_s0 + $0x60] ss:$8 sps:$4 sm:$0xff]  }
  0x37   :  { %v1273_v59 = vld [vmem:[%s1586_s0 + $0x74] ss:$8 sps:$4 sm:$0xff]   ;;  %v1275_v60 = vld [vmem:[%s1586_s0 + $0x70] ss:$8 sps:$4 sm:$0xff]   ;;  %v1292_v1 = vld [vmem:[%s1588_s2] sm:$0xff]  }
  0x38   :  { %v1288_v61 = vld [vmem:[%s1590_s4 + $0x70] sm:$0xff]   ;;  %v1290_v63 = vld [vmem:[%s1590_s4 + $0x78] sm:$0xff]   ;;  %806 = vmatprep.mubr.bf16.mxu1 %v1292_v1  ;;  %v1293_v13 = vld [vmem:[%s1588_s2 + $0x8] sm:$0xff]  }
  0x39   :  { %v1289_v62 = vld [vmem:[%s1590_s4 + $0x30] sm:$0xff]   ;;  %1178 = vmatprep.subr.bf16.mxu1 %v1288_v61  ;;  %v1291_v0 = vld [vmem:[%s1590_s4 + $0x38] sm:$0xff]   ;;  %v1296_v48 = vld [vmem:[%s1588_s2 + $0x20] sm:$0xff]  }
  0x3a   :  { %339 = vmatmul.mubr.bf16.gmra.mrb[12].mxu0 %v1263_v52  ;;  %1179 = vmatpush3.bf16.msra.mxu1 %v1289_v62  ;;  %v1294_v24 = vld [vmem:[%s1588_s2 + $0x10] sm:$0xff]   ;;  %v1295_v36 = vld [vmem:[%s1588_s2 + $0x18] sm:$0xff]  }
  0x3b   :  { %346 = vmatprep.mubr.bf16.mxu0 %v1264_v53  ;;  %1180 = vmatprep.subr.bf16.mxu1 %v1290_v63 }
  0x3e   :  { %1181 = vmatpush3.bf16.msra.mxu1 %v1291_v0 }
  0x42   :  { %347 = vmatmul.mubr.bf16.gmra.mrb[16].mxu0 %v1266_v54 }
  0x43   :  { %354 = vmatprep.mubr.bf16.mxu0 %v1267_v55 }
  0x4a   :  { %355 = vmatmul.mubr.bf16.gmra.mrb[20].mxu0 %v1269_v56 }
  0x4b   :  { %362 = vmatprep.mubr.bf16.mxu0 %v1270_v57 }
  0x52   :  { %363 = vmatmul.mubr.bf16.gmra.mrb[24].mxu0 %v1272_v58 }
  0x53   :  { %370 = vmatprep.mubr.bf16.mxu0 %v1273_v59 }
  0x5a   :  { %371 = vmatmul.mubr.bf16.gmra.mrb[28].mxu0 %v1275_v60  ;;  %v1297_v60 = vld [vmem:[%s1588_s2 + $0x28] sm:$0xff]  }
  0x86   :  { %v449_v2 = vpop.permute.xlu0 %448 }
  0x87   :  { %v459_v12 = vpop.permute.xlu1 %458 }
  0x8a   :  { %v454_v9 = vpop.permute.xlu0 %453 }
  0x8b   :  { %v464_v21 = vpop.permute.xlu1 %463 }
  0x8e   :  { %v469_v32 = vpop.permute.xlu0 %468 }
  0x8f   :  { %v474_v33 = vpop.permute.xlu1 %473 }
  0x92   :  { %v479_v44 = vpop.permute.xlu0 %478 }
  0x93   :  { %v484_v45 = vpop.permute.xlu1 %483 }
  0x96   :  { %v489_v56 = vpop.permute.xlu0 %488 }
  0x97   :  { %v494_v57 = vpop.permute.xlu1 %493 }
  0xf5   :  { %v1118_v3 = vpop.f32.mrb[0].mxu0 }
  0xf6   :  { %v1119_v4 = vpop.f32.mrb[1].mxu0 }
  0xf7   :  { %v1120_v5 = vadd.f32 %v1119_v4, %v1118_v3  ;;  %v1121_v6 = vpop.f32.mrb[2].mxu0  ;;  %v499_v4 = vpop.permute.xlu0 %498 }
  0xf8   :  { %v1122_v7 = vpop.f32.mrb[3].mxu0 }
  0xf9   :  { %v1123_v8 = vadd.f32 %v1122_v7, %v1121_v6  ;;  %v526_v10 = vmul.f32 %v1120_v5, %v449_v2  ;;  %v504_v5 = vpop.permute.xlu1 %503 }
  0xfb   :  { %v527_v11 = vmul.f32 %v1123_v8, %v454_v9  ;;  %v1298_v8 = vld [vmem:[%s1588_s2 + $0x30] sm:$0xff]  }
  0xfd   :  { %v1124_v14 = vpop.f32.mrb[4].mxu0  ;;  %v542_v15 = vpack.c.bf16 %v527_v11, %v526_v10 }
  0xfe   :  { %v1125_v16 = vpop.f32.mrb[5].mxu0 }
  0xff   :  { %v1126_v17 = vadd.f32 %v1125_v16, %v1124_v14  ;;  %v1127_v18 = vpop.f32.mrb[6].mxu0  ;;  %807 = vmatmul.mubr.bf16.vlgmr.msra.gmra.mrb[0].mxu1 %v542_v15  ;;  %v509_v16 = vpop.permute.xlu0 %508 }
 0x100   :  { %v1128_v19 = vpop.f32.mrb[7].mxu0  ;;  %814 = vmatprep.mubr.bf16.mxu1 %v1293_v13 }
 0x101   :  { %v1129_v20 = vadd.f32 %v1128_v19, %v1127_v18  ;;  %v528_v22 = vmul.f32 %v1126_v17, %v459_v12  ;;  %v514_v17 = vpop.permute.xlu1 %513 }
 0x103   :  { %v529_v23 = vmul.f32 %v1129_v20, %v464_v21  ;;  %v1299_v20 = vld [vmem:[%s1588_s2 + $0x38] sm:$0xff]   ;;  %s1325_s2 = smov [#allocation4]  }
 0x104   :  { %s956_s29 = sshll.u32 %s1325_s2, 4  ;;  %s957_s29 = int_to_ptr.vmem [resolvable:$true] %s956_s29 }
 0x105   :  { %v1130_v25 = vpop.f32.mrb[8].mxu0  ;;  %v543_v26 = vpack.c.bf16 %v529_v23, %v528_v22  ;;  %s1300_s30 = scalar_lea.vmem %s957_s29, 1024  ;;  %p1305_p1 = scmp.lt.s32.totalorder %s957_s29, %s957_s29 }
 0x106   :  { %v1131_v27 = vpop.f32.mrb[9].mxu0  ;;  %p1301_p0 = scmp.ne.s32.totalorder %s957_s29, %s1300_s30  ;;  %p1306_p2 = scmp.lt.s32.totalorder %s1300_s30, %s1300_s30 }
 0x107   :  { %v1132_v28 = vadd.f32 %v1131_v27, %v1130_v25  ;;  %v1133_v29 = vpop.f32.mrb[10].mxu0  ;;  %815 = vmatmul.mubr.bf16.gmra.mrb[4].mxu1 %v543_v26 }
 0x108   :  { %v1134_v30 = vpop.f32.mrb[11].mxu0  ;;  %822 = vmatprep.mubr.bf16.mxu1 %v1294_v24  ;;  %p1307_p3 = por %p1306_p2, %p1305_p1 }
 0x109   :  { %v1135_v31 = vadd.f32 %v1134_v30, %v1133_v29  ;;  %v530_v34 = vmul.f32 %v1132_v28, %v469_v32  ;;  %v519_v28 = vpop.permute.xlu0 %518  ;;  %v524_v29 = vpop.permute.xlu1 %523 }
 0x10a   :  { %p1308_p4 = pnand %p1307_p3, %p1301_p0 }
 0x10b   :  { %v531_v35 = vmul.f32 %v1135_v31, %v474_v33 }
 0x10d   :  { %v1136_v37 = vpop.f32.mrb[12].mxu0  ;;  %v544_v38 = vpack.c.bf16 %v531_v35, %v530_v34 }
 0x10e   :  { %v1137_v39 = vpop.f32.mrb[13].mxu0 }
 0x10f   :  { %v1138_v40 = vadd.f32 %v1137_v39, %v1136_v37  ;;  %v1139_v41 = vpop.f32.mrb[14].mxu0  ;;  %823 = vmatmul.mubr.bf16.gmra.mrb[8].mxu1 %v544_v38 }
 0x110   :  { %v1140_v42 = vpop.f32.mrb[15].mxu0  ;;  %830 = vmatprep.mubr.bf16.mxu1 %v1295_v36 }
 0x111   :  { %v1141_v43 = vadd.f32 %v1140_v42, %v1139_v41  ;;  %v532_v46 = vmul.f32 %v1138_v40, %v479_v44 }
 0x113   :  { %v533_v47 = vmul.f32 %v1141_v43, %v484_v45 }
 0x115   :  { %v1142_v49 = vpop.f32.mrb[16].mxu0  ;;  %v545_v50 = vpack.c.bf16 %v533_v47, %v532_v46 }
 0x116   :  { %v1143_v51 = vpop.f32.mrb[17].mxu0 }
 0x117   :  { %v1144_v52 = vadd.f32 %v1143_v51, %v1142_v49  ;;  %v1145_v53 = vpop.f32.mrb[18].mxu0  ;;  %831 = vmatmul.mubr.bf16.gmra.mrb[12].mxu1 %v545_v50 }
 0x118   :  { %v1146_v54 = vpop.f32.mrb[19].mxu0  ;;  %838 = vmatprep.mubr.bf16.mxu1 %v1296_v48 }
 0x119   :  { %v1147_v55 = vadd.f32 %v1146_v54, %v1145_v53  ;;  %v534_v58 = vmul.f32 %v1144_v52, %v489_v56 }
 0x11b   :  { %v535_v59 = vmul.f32 %v1147_v55, %v494_v57 }
 0x11d   :  { %v1148_v61 = vpop.f32.mrb[20].mxu0  ;;  %v546_v62 = vpack.c.bf16 %v535_v59, %v534_v58 }
 0x11e   :  { %v1149_v63 = vpop.f32.mrb[21].mxu0 }
 0x11f   :  { %v1150_v0 = vadd.f32 %v1149_v63, %v1148_v61  ;;  %v1151_v1 = vpop.f32.mrb[22].mxu0  ;;  %839 = vmatmul.mubr.bf16.gmra.mrb[16].mxu1 %v546_v62 }
 0x120   :  { %v1152_v2 = vpop.f32.mrb[23].mxu0  ;;  %846 = vmatprep.mubr.bf16.mxu1 %v1297_v60 }
 0x121   :  { %v1153_v3 = vadd.f32 %v1152_v2, %v1151_v1  ;;  %v536_v6 = vmul.f32 %v1150_v0, %v499_v4 }
 0x123   :  { %v537_v7 = vmul.f32 %v1153_v3, %v504_v5 }
 0x125   :  { %v1154_v9 = vpop.f32.mrb[24].mxu0  ;;  %v547_v10 = vpack.c.bf16 %v537_v7, %v536_v6 }
 0x126   :  { %v1155_v11 = vpop.f32.mrb[25].mxu0 }
 0x127   :  { %v1156_v12 = vadd.f32 %v1155_v11, %v1154_v9  ;;  %v1157_v13 = vpop.f32.mrb[26].mxu0  ;;  %847 = vmatmul.mubr.bf16.gmra.mrb[20].mxu1 %v547_v10 }
 0x128   :  { %v1158_v14 = vpop.f32.mrb[27].mxu0  ;;  %854 = vmatprep.mubr.bf16.mxu1 %v1298_v8 }
 0x129   :  { %v1159_v15 = vadd.f32 %v1158_v14, %v1157_v13  ;;  %v538_v18 = vmul.f32 %v1156_v12, %v509_v16 }
 0x12b   :  { %v539_v19 = vmul.f32 %v1159_v15, %v514_v17 }
 0x12d   :  { %v1160_v21 = vpop.f32.mrb[28].mxu0  ;;  %v548_v22 = vpack.c.bf16 %v539_v19, %v538_v18 }
 0x12e   :  { %v1161_v23 = vpop.f32.mrb[29].mxu0 }
 0x12f   :  { %v1162_v24 = vadd.f32 %v1161_v23, %v1160_v21  ;;  %v1163_v25 = vpop.f32.mrb[30].mxu0  ;;  %855 = vmatmul.mubr.bf16.gmra.mrb[24].mxu1 %v548_v22 }
 0x130   :  { %v1164_v26 = vpop.f32.mrb[31].mxu0  ;;  %862 = vmatprep.mubr.bf16.mxu1 %v1299_v20 }
 0x131   :  { %v1165_v27 = vadd.f32 %v1164_v26, %v1163_v25  ;;  %v540_v30 = vmul.f32 %v1162_v24, %v519_v28 }
 0x133   :  { %v541_v31 = vmul.f32 %v1165_v27, %v524_v29 }
 0x135   :  { %v549_v32 = vpack.c.bf16 %v541_v31, %v540_v30 }
 0x137   :  { %863 = vmatmul.mubr.bf16.gmra.mrb[28].mxu1 %v549_v32 }
 0x1d2   :  { %v1182_v33 = vpop.f32.mrb[0].mxu1 }
 0x1d3   :  { %v1183_v34 = vpop.f32.mrb[1].mxu1 }
 0x1d4   :  { %v1184_v35 = vadd.f32 %v1183_v34, %v1182_v33  ;;  %v1185_v36 = vpop.f32.mrb[2].mxu1 }
 0x1d5   :  { %v1186_v37 = vpop.f32.mrb[3].mxu1 }
 0x1d6   :  { %v1187_v38 = vadd.f32 %v1186_v37, %v1185_v36 }
 0x1d8   :  { %v1058_v39 = vpack.c.bf16 %v1187_v38, %v1184_v35 }
 0x1da   :  { %1059 = vst [vmem:[#allocation4] sm:$0xff] %v1058_v39   ;;  %v1188_v40 = vpop.f32.mrb[4].mxu1 }
 0x1db   :  { %v1189_v41 = vpop.f32.mrb[5].mxu1 }
 0x1dc   :  { %v1190_v42 = vadd.f32 %v1189_v41, %v1188_v40  ;;  %v1191_v43 = vpop.f32.mrb[6].mxu1 }
 0x1dd   :  { %v1192_v44 = vpop.f32.mrb[7].mxu1 }
 0x1de   :  { %v1193_v45 = vadd.f32 %v1192_v44, %v1191_v43 }
 0x1e0   :  { %v1063_v46 = vpack.c.bf16 %v1193_v45, %v1190_v42 }
 0x1e2   :  { %1095 = vst [vmem:[#allocation4 + $0x8] sm:$0xff] %v1063_v46   ;;  %v1194_v47 = vpop.f32.mrb[8].mxu1 }
 0x1e3   :  { %v1195_v48 = vpop.f32.mrb[9].mxu1 }
 0x1e4   :  { %v1196_v49 = vadd.f32 %v1195_v48, %v1194_v47  ;;  %v1197_v50 = vpop.f32.mrb[10].mxu1 }
 0x1e5   :  { %v1198_v51 = vpop.f32.mrb[11].mxu1 }
 0x1e6   :  { %v1199_v52 = vadd.f32 %v1198_v51, %v1197_v50 }
 0x1e8   :  { %v1068_v53 = vpack.c.bf16 %v1199_v52, %v1196_v49 }
 0x1ea   :  { %1096 = vst [vmem:[#allocation4 + $0x10] sm:$0xff] %v1068_v53   ;;  %v1200_v54 = vpop.f32.mrb[12].mxu1 }
 0x1eb   :  { %v1201_v55 = vpop.f32.mrb[13].mxu1 }
 0x1ec   :  { %v1202_v56 = vadd.f32 %v1201_v55, %v1200_v54  ;;  %v1203_v57 = vpop.f32.mrb[14].mxu1 }
 0x1ed   :  { %v1204_v58 = vpop.f32.mrb[15].mxu1 }
 0x1ee   :  { %v1205_v59 = vadd.f32 %v1204_v58, %v1203_v57 }
 0x1f0   :  { %v1073_v60 = vpack.c.bf16 %v1205_v59, %v1202_v56 }
 0x1f2   :  { %1097 = vst [vmem:[#allocation4 + $0x18] sm:$0xff] %v1073_v60   ;;  %v1206_v61 = vpop.f32.mrb[16].mxu1 }
 0x1f3   :  { %v1207_v62 = vpop.f32.mrb[17].mxu1 }
 0x1f4   :  { %v1208_v63 = vadd.f32 %v1207_v62, %v1206_v61  ;;  %v1209_v0 = vpop.f32.mrb[18].mxu1 }
 0x1f5   :  { %v1210_v1 = vpop.f32.mrb[19].mxu1 }
 0x1f6   :  { %v1211_v2 = vadd.f32 %v1210_v1, %v1209_v0 }
 0x1f8   :  { %v1078_v3 = vpack.c.bf16 %v1211_v2, %v1208_v63 }
 0x1fa   :  { %1098 = vst [vmem:[#allocation4 + $0x20] sm:$0xff] %v1078_v3   ;;  %v1212_v4 = vpop.f32.mrb[20].mxu1 }
 0x1fb   :  { %v1213_v5 = vpop.f32.mrb[21].mxu1 }
 0x1fc   :  { %v1214_v6 = vadd.f32 %v1213_v5, %v1212_v4  ;;  %v1215_v7 = vpop.f32.mrb[22].mxu1 }
 0x1fd   :  { %v1216_v8 = vpop.f32.mrb[23].mxu1 }
 0x1fe   :  { %v1217_v9 = vadd.f32 %v1216_v8, %v1215_v7 }
 0x200   :  { %v1083_v10 = vpack.c.bf16 %v1217_v9, %v1214_v6 }
 0x202   :  { %1099 = vst [vmem:[#allocation4 + $0x28] sm:$0xff] %v1083_v10   ;;  %v1218_v11 = vpop.f32.mrb[24].mxu1 }
 0x203   :  { %v1219_v12 = vpop.f32.mrb[25].mxu1 }
 0x204   :  { %v1220_v13 = vadd.f32 %v1219_v12, %v1218_v11  ;;  %v1221_v14 = vpop.f32.mrb[26].mxu1 }
 0x205   :  { %v1222_v15 = vpop.f32.mrb[27].mxu1 }
 0x206   :  { %v1223_v16 = vadd.f32 %v1222_v15, %v1221_v14 }
 0x208   :  { %v1088_v17 = vpack.c.bf16 %v1223_v16, %v1220_v13 }
 0x20a   :  { %1100 = vst [vmem:[#allocation4 + $0x30] sm:$0xff] %v1088_v17   ;;  %v1224_v18 = vpop.f32.mrb[28].mxu1 }
 0x20b   :  { %v1225_v19 = vpop.f32.mrb[29].mxu1 }
 0x20c   :  { %v1226_v20 = vadd.f32 %v1225_v19, %v1224_v18  ;;  %v1227_v21 = vpop.f32.mrb[30].mxu1 }
 0x20d   :  { %v1228_v22 = vpop.f32.mrb[31].mxu1 }
 0x20e   :  { %v1229_v23 = vadd.f32 %v1228_v22, %v1227_v21 }
 0x210   :  { %v1093_v24 = vpack.c.bf16 %v1229_v23, %v1226_v20 }
 0x212   :  { %1101 = vst [vmem:[#allocation4 + $0x38] sm:$0xff] %v1093_v24  }
 0x213   :  { %1311 = shalt.err (!%p1308_p4)
}
 0x214   :  { %s1312_s8 = scalar_lea.hbm %s1591_s5, 1024 }
 0x215   :  { %p1313_p5 = scmp.ne.s32.totalorder %s1591_s5, %s1312_s8  ;;  %p1316_p6 = scmp.lt.u32.totalorder %s1312_s8, %s1591_s5 }
 0x217   :  { %p1318_p7 = pnand %p1316_p6, %p1313_p5 }
 0x219   :  { %1321 = shalt.err (!%p1318_p7)
}
 0x21a   :  { %s1326_s12 = smov 64   ;;  %s1327_s13 = smov 4  }
 0x21b   :  { %962 = dma.vmem_to_hbm [thread:$0]  %s957_s29, 1024, %s1591_s5, [#allocation5], %s1326_s12, %s1326_s12, %s1327_s13  }
 0x21c   :  { %1322 = dma.done.wait [#allocation5], 1024  }
 0x21d   :  { %1323 = vsyncadd [#allocation5], 4294966272 }
 0x21e   :  { %966 = vsyncpa [#allocation5], 1 }

</bundles_post_ra>
